<compile_context>
chip_gen: v6e
topology: v6e:2x2x1
jax: 0.10.0
libtpu: 0.0.40
codegen_flags: <defaults>
</compile_context>

<pallas_src>
import jax
import jax.numpy as jnp
from jax.experimental import pallas as pl
from jax.experimental.pallas import tpu as pltpu


def _softplus(x):
    # Stable softplus: log(1 + exp(x)) without overflow (plain VPU/EUP elementwise ops).
    return jnp.maximum(x, 0.0) + jnp.log(1.0 + jnp.exp(-jnp.abs(x)))


def sine_batched_kernel(src_idx_ref, tgt_idx_ref,   # scalar-prefetch refs (SMEM)
                        emb_ref, nf_ref,            # VMEM-resident embedding tables
                        out_ref,                    # (TILE_B, 1) per-sample losses
                        tbuf):                      # (TILE_B * N, D) gather scratch
    tile_b = out_ref.shape[0]
    n = tbuf.shape[0] // tile_b
    tile = pl.program_id(0)

    # NOTE: indices are trusted -- VMEM dynamic slices carry no bounds check.
    for j in range(tile_b):                          # static unroll; tile_b is small
        sample = tile * tile_b + j
        # Source node embedding row, gathered from the resident table.
        s_row = emb_ref[pl.ds(src_idx_ref[sample], 1), :].astype(jnp.float32)   # (1, D)

        # Gather the N context rows for this sample into scratch (VMEM-local slices;
        # no HBM round trips).
        base = j * n
        for r in range(n):
            t_idx = tgt_idx_ref[sample * n + r]
            tbuf[pl.ds(base + r, 1), :] = nf_ref[pl.ds(t_idx, 1), :]
        tm = tbuf[pl.ds(base, n), :].astype(jnp.float32)                        # (N, D)

        # Row-wise dot products with the (sublane-broadcast) source row.
        s = jnp.sum(tm * s_row, axis=1, keepdims=True)                          # (N, 1)
        s = jnp.clip(s, -20.0, 20.0)           # keep PyTorch's clamp(-20, 20) behavior

        # Row 0 is the positive sample, rows 1..N-1 are negatives.
        #   log(sigmoid(s))     = -softplus(-s)
        #   log(1 - sigmoid(s)) = -softplus(s)
        is_pos = jax.lax.broadcasted_iota(jnp.int32, (n, 1), 0) == 0
        log_prob = jnp.where(is_pos, -_softplus(-s), -_softplus(s))
        out_ref[pl.ds(j, 1), :] = (-jnp.mean(log_prob, keepdims=True)).astype(out_ref.dtype)


def sine_loss_batched_pallas(node_embedding, noise_factors, source_idx, target_idx,
                             *, tile_b=8):
    """Batched SINE loss.  source_idx: (B,), target_idx: (B, N).  Returns (B,) f32."""
    node_embedding = jnp.asarray(node_embedding)
    noise_factors = jnp.asarray(noise_factors)
    source_idx = jnp.asarray(source_idx, jnp.int32)
    target_idx = jnp.asarray(target_idx, jnp.int32)
    b, n = target_idx.shape
    d = int(node_embedding.shape[1])

    # Pad the batch to a multiple of tile_b (row 0 is always a valid index).
    padded_b = int(pl.cdiv(b, tile_b)) * tile_b
    if padded_b != b:
        source_idx = jnp.concatenate(
            [source_idx, jnp.zeros((padded_b - b,), jnp.int32)])
        target_idx = jnp.concatenate(
            [target_idx, jnp.zeros((padded_b - b, n), jnp.int32)], axis=0)
    num_tiles = padded_b // tile_b
    tgt_flat = target_idx.reshape(-1)

    # Both tables are pinned whole in VMEM (one DMA each, resident across the grid).
    # Budget 2x per table for the pipeline's buffering, plus gather scratch + slack.
    table_bytes = (node_embedding.size * node_embedding.dtype.itemsize
                   + noise_factors.size * noise_factors.dtype.itemsize)
    vmem_needed = 2 * table_bytes + tile_b * n * d * noise_factors.dtype.itemsize + (1 << 20)
    vmem_limit = int(min(max(vmem_needed, 32 * 2**20), 64 * 2**20))

    out = pl.pallas_call(
        sine_batched_kernel,
        out_shape=jax.ShapeDtypeStruct((padded_b, 1), jnp.float32),
        grid_spec=pltpu.PrefetchScalarGridSpec(
            num_scalar_prefetch=2,                   # source_idx, target_idx -> SMEM
            grid=(num_tiles,),
            in_specs=[
                # Full-array block + constant index_map => each table is DMA'd into
                # VMEM once and stays resident for every grid step.
                pl.BlockSpec(tuple(node_embedding.shape), lambda i, s, t: (0, 0)),
                pl.BlockSpec(tuple(noise_factors.shape), lambda i, s, t: (0, 0)),
            ],
            out_specs=pl.BlockSpec((tile_b, 1), lambda i, s, t: (i, 0)),
            scratch_shapes=[
                pltpu.VMEM((tile_b * n, d), noise_factors.dtype),   # gathered rows
            ],
        ),
        compiler_params=pltpu.CompilerParams(
            dimension_semantics=("parallel",),       # shards sample tiles across TCs
            vmem_limit_bytes=vmem_limit,
        ),
    )(source_idx, tgt_flat, node_embedding, noise_factors)
    return out[:b, 0]


def sine_loss_pallas(node_embedding, noise_factors, source_idx, target_idx):
    """Single-sample SINE loss (module-parity interface): scalar source, (N,) target."""
    src = jnp.asarray(source_idx, jnp.int32).reshape(1)
    tgt = jnp.asarray(target_idx, jnp.int32).reshape(1, -1)
    return sine_loss_batched_pallas(node_embedding, noise_factors, src, tgt)[0]


def xavier_normal(key, shape):
    # torch.nn.init.xavier_normal_ for a 2D tensor: fan_out = shape[0], fan_in = shape[1]
    fan_out, fan_in = shape
    std = (2.0 / float(fan_in + fan_out)) ** 0.5
    return std * jax.random.normal(key, shape, dtype=jnp.float32)


class SINELayerPallas:
    """JAX/Pallas port of SINELayer (deterministic synthetic init)."""

    def __init__(self, num_nodes, num_features, dimensions, noise_samples, key):
        k1, k2, k3 = jax.random.split(key, 3)
        # NOTE: matches PyTorch, where xavier_normal_ overwrites the padding_idx
        # row zeroing done at Embedding construction.
        self.node_embedding = xavier_normal(k1, (num_nodes, dimensions))
        self.node_noise_factors = xavier_normal(k2, (num_nodes, dimensions))
        self.feature_noise_factors = xavier_normal(k3, (num_features, dimensions))
        self.noise_samples = noise_samples

    def _table(self, score):
        # Python-level branch, as in the PyTorch module.  (Trap: `score` must stay a
        # host-side float; a traced value under jit would break this branch.)
        return self.node_noise_factors if score > 0.5 else self.feature_noise_factors

    def forward(self, source, target, score):
        """Single (source, target, score) sample -- mirrors SINELayer.forward."""
        return sine_loss_pallas(self.node_embedding, self._table(score), source, target)

    def forward_batch(self, sources, targets, score):
        """Batched entry point: sources (B,), targets (B, N); ONE kernel launch."""
        return sine_loss_batched_pallas(self.node_embedding, self._table(score),
                                        sources, targets)


def sine_loss_ref(node_embedding, table, source, target):
    # Pure-JAX reference in the original clamp->sigmoid->log form.
    sv = node_embedding[source][None, :]
    tm = table[target]
    s = jnp.clip(jnp.sum(tm * sv, axis=1), -20.0, 20.0)
    p = jax.nn.sigmoid(s)
    t = jnp.concatenate([jnp.ones((1,), jnp.float32),
                         jnp.zeros((target.shape[0] - 1,), jnp.float32)])
    loss = t * jnp.log(p) + (1.0 - t) * jnp.log(1.0 - p)
    return -jnp.mean(loss)


def sine_loss_ref_batch(node_embedding, table, sources, targets):
    sv = node_embedding[sources]                                   # (B, D)
    tm = table[targets]                                            # (B, N, D)
    s = jnp.clip(jnp.sum(tm * sv[:, None, :], axis=2), -20.0, 20.0)
    p = jax.nn.sigmoid(s)
    t = jnp.concatenate([jnp.ones((1,), jnp.float32),
                         jnp.zeros((targets.shape[1] - 1,), jnp.float32)])[None, :]
    loss = t * jnp.log(p) + (1.0 - t) * jnp.log(1.0 - p)
    return -jnp.mean(loss, axis=1)


if __name__ == "__main__":
    key = jax.random.PRNGKey(0)
    num_nodes, num_features = 16, 16
    dimensions = 128                      # lane-dense: D is a multiple of 128
    noise_samples = 7                     # N = noise_samples + 1 = 8 context rows

    layer = SINELayerPallas(num_nodes, num_features, dimensions, noise_samples,
                            jax.random.fold_in(key, 1))

    # --- single-sample forward (module parity), both score branches.
    source = 3
    target = jax.random.randint(jax.random.fold_in(key, 2),
                                (noise_samples + 1,), 0, num_nodes)
    loss_node = layer.forward(source, target, score=0.7)
    loss_feat = layer.forward(source, target, score=0.3)

    # --- batched forward: many samples in ONE kernel launch (batch not a multiple
    # of the 8-sample tile, to exercise padding).
    batch = 12
    sources = jax.random.randint(jax.random.fold_in(key, 3), (batch,), 0, num_nodes)
    targets = jax.random.randint(jax.random.fold_in(key, 4),
                                 (batch, noise_samples + 1), 0, num_nodes)
    losses = layer.forward_batch(sources, targets, score=0.7)
    jax.block_until_ready((loss_node, loss_feat, losses))

    ref_node = sine_loss_ref(layer.node_embedding, layer.node_noise_factors, source, target)
    ref_feat = sine_loss_ref(layer.node_embedding, layer.feature_noise_factors, source, target)
    ref_batch = sine_loss_ref_batch(layer.node_embedding, layer.node_noise_factors,
                                    sources, targets)

    assert loss_node.shape == () and loss_feat.shape == ()
    assert losses.shape == (batch,)
    assert bool(jnp.isfinite(loss_node)) and bool(jnp.isfinite(loss_feat))
    assert bool(jnp.all(jnp.isfinite(losses)))
    assert abs(float(loss_node) - float(ref_node)) < 1e-5
    assert abs(float(loss_feat) - float(ref_feat)) < 1e-5
    assert float(jnp.max(jnp.abs(losses - ref_batch))) < 1e-5

    print("KERNEL_OK")
</pallas_src>

<mosaic_0001>
module attributes {stable_mosaic.version = 11 : i64} {
  func.func @sine_batched_kernel(%arg0: i32, %arg1: memref<8xi32, #tpu.memory_space<smem>>, %arg2: memref<64xi32, #tpu.memory_space<smem>>, %arg3: memref<16x128xf32, #tpu.memory_space<vmem>>, %arg4: memref<16x128xf32, #tpu.memory_space<vmem>>, %arg5: memref<8x1xf32, #tpu.memory_space<vmem>>, %arg6: memref<64x128xf32, #tpu.memory_space<vmem>>) attributes {dimension_semantics = [#tpu.dimension_semantics<parallel>], iteration_bounds = array<i64: 1>, scalar_prefetch = 2 : i64, scratch_operands = 1 : i64, tpu.core_type = #tpu.core_type<tc>, window_params = [{pipeline_mode = #tpu.pipeline_mode<synchronous>, transform_indices = @transform_0, window_bounds = array<i64: 16, 128>}, {pipeline_mode = #tpu.pipeline_mode<synchronous>, transform_indices = @transform_1, window_bounds = array<i64: 16, 128>}, {transform_indices = @transform_2, window_bounds = array<i64: 8, 1>}]} {
    %c8_i32 = arith.constant 8 : i32
    %0 = arith.muli %arg0, %c8_i32 : i32
    %c0_i32 = arith.constant 0 : i32
    %1 = arith.addi %0, %c0_i32 : i32
    %2 = arith.index_cast %1 : i32 to index
    %3 = memref.load %arg1[%2] : memref<8xi32, #tpu.memory_space<smem>>
    %4 = arith.index_cast %3 : i32 to index
    %c0 = arith.constant 0 : index
    %5 = vector.load %arg3[%4, %c0] : memref<16x128xf32, #tpu.memory_space<vmem>>, vector<1x128xf32>
    %c8_i32_0 = arith.constant 8 : i32
    %6 = arith.muli %1, %c8_i32_0 : i32
    %c0_i32_1 = arith.constant 0 : i32
    %7 = arith.addi %6, %c0_i32_1 : i32
    %8 = arith.index_cast %7 : i32 to index
    %9 = memref.load %arg2[%8] : memref<64xi32, #tpu.memory_space<smem>>
    %10 = arith.index_cast %9 : i32 to index
    %c0_2 = arith.constant 0 : index
    %11 = vector.load %arg4[%10, %c0_2] : memref<16x128xf32, #tpu.memory_space<vmem>>, vector<1x128xf32>
    %c0_3 = arith.constant 0 : index
    %c0_4 = arith.constant 0 : index
    %12 = vector.load %arg6[%c0_3, %c0_4] : memref<64x128xf32, #tpu.memory_space<vmem>>, vector<1x128xf32>
    tpu.vector_store %arg6[%c0_3, %c0_4], %11 {strides = array<i32>} : memref<64x128xf32, #tpu.memory_space<vmem>>, vector<1x128xf32>,
    %c8_i32_5 = arith.constant 8 : i32
    %13 = arith.muli %1, %c8_i32_5 : i32
    %c1_i32 = arith.constant 1 : i32
    %14 = arith.addi %13, %c1_i32 : i32
    %15 = arith.index_cast %14 : i32 to index
    %16 = memref.load %arg2[%15] : memref<64xi32, #tpu.memory_space<smem>>
    %17 = arith.index_cast %16 : i32 to index
    %c0_6 = arith.constant 0 : index
    %18 = vector.load %arg4[%17, %c0_6] : memref<16x128xf32, #tpu.memory_space<vmem>>, vector<1x128xf32>
    %c1 = arith.constant 1 : index
    %c0_7 = arith.constant 0 : index
    %19 = vector.load %arg6[%c1, %c0_7] : memref<64x128xf32, #tpu.memory_space<vmem>>, vector<1x128xf32>
    tpu.vector_store %arg6[%c1, %c0_7], %18 {strides = array<i32>} : memref<64x128xf32, #tpu.memory_space<vmem>>, vector<1x128xf32>,
    %c8_i32_8 = arith.constant 8 : i32
    %20 = arith.muli %1, %c8_i32_8 : i32
    %c2_i32 = arith.constant 2 : i32
    %21 = arith.addi %20, %c2_i32 : i32
    %22 = arith.index_cast %21 : i32 to index
    %23 = memref.load %arg2[%22] : memref<64xi32, #tpu.memory_space<smem>>
    %24 = arith.index_cast %23 : i32 to index
    %c0_9 = arith.constant 0 : index
    %25 = vector.load %arg4[%24, %c0_9] : memref<16x128xf32, #tpu.memory_space<vmem>>, vector<1x128xf32>
    %c2 = arith.constant 2 : index
    %c0_10 = arith.constant 0 : index
    %26 = vector.load %arg6[%c2, %c0_10] : memref<64x128xf32, #tpu.memory_space<vmem>>, vector<1x128xf32>
    tpu.vector_store %arg6[%c2, %c0_10], %25 {strides = array<i32>} : memref<64x128xf32, #tpu.memory_space<vmem>>, vector<1x128xf32>,
    %c8_i32_11 = arith.constant 8 : i32
    %27 = arith.muli %1, %c8_i32_11 : i32
    %c3_i32 = arith.constant 3 : i32
    %28 = arith.addi %27, %c3_i32 : i32
    %29 = arith.index_cast %28 : i32 to index
    %30 = memref.load %arg2[%29] : memref<64xi32, #tpu.memory_space<smem>>
    %31 = arith.index_cast %30 : i32 to index
    %c0_12 = arith.constant 0 : index
    %32 = vector.load %arg4[%31, %c0_12] : memref<16x128xf32, #tpu.memory_space<vmem>>, vector<1x128xf32>
    %c3 = arith.constant 3 : index
    %c0_13 = arith.constant 0 : index
    %33 = vector.load %arg6[%c3, %c0_13] : memref<64x128xf32, #tpu.memory_space<vmem>>, vector<1x128xf32>
    tpu.vector_store %arg6[%c3, %c0_13], %32 {strides = array<i32>} : memref<64x128xf32, #tpu.memory_space<vmem>>, vector<1x128xf32>,
    %c8_i32_14 = arith.constant 8 : i32
    %34 = arith.muli %1, %c8_i32_14 : i32
    %c4_i32 = arith.constant 4 : i32
    %35 = arith.addi %34, %c4_i32 : i32
    %36 = arith.index_cast %35 : i32 to index
    %37 = memref.load %arg2[%36] : memref<64xi32, #tpu.memory_space<smem>>
    %38 = arith.index_cast %37 : i32 to index
    %c0_15 = arith.constant 0 : index
    %39 = vector.load %arg4[%38, %c0_15] : memref<16x128xf32, #tpu.memory_space<vmem>>, vector<1x128xf32>
    %c4 = arith.constant 4 : index
    %c0_16 = arith.constant 0 : index
    %40 = vector.load %arg6[%c4, %c0_16] : memref<64x128xf32, #tpu.memory_space<vmem>>, vector<1x128xf32>
    tpu.vector_store %arg6[%c4, %c0_16], %39 {strides = array<i32>} : memref<64x128xf32, #tpu.memory_space<vmem>>, vector<1x128xf32>,
    %c8_i32_17 = arith.constant 8 : i32
    %41 = arith.muli %1, %c8_i32_17 : i32
    %c5_i32 = arith.constant 5 : i32
    %42 = arith.addi %41, %c5_i32 : i32
    %43 = arith.index_cast %42 : i32 to index
    %44 = memref.load %arg2[%43] : memref<64xi32, #tpu.memory_space<smem>>
    %45 = arith.index_cast %44 : i32 to index
    %c0_18 = arith.constant 0 : index
    %46 = vector.load %arg4[%45, %c0_18] : memref<16x128xf32, #tpu.memory_space<vmem>>, vector<1x128xf32>
    %c5 = arith.constant 5 : index
    %c0_19 = arith.constant 0 : index
    %47 = vector.load %arg6[%c5, %c0_19] : memref<64x128xf32, #tpu.memory_space<vmem>>, vector<1x128xf32>
    tpu.vector_store %arg6[%c5, %c0_19], %46 {strides = array<i32>} : memref<64x128xf32, #tpu.memory_space<vmem>>, vector<1x128xf32>,
    %c8_i32_20 = arith.constant 8 : i32
    %48 = arith.muli %1, %c8_i32_20 : i32
    %c6_i32 = arith.constant 6 : i32
    %49 = arith.addi %48, %c6_i32 : i32
    %50 = arith.index_cast %49 : i32 to index
    %51 = memref.load %arg2[%50] : memref<64xi32, #tpu.memory_space<smem>>
    %52 = arith.index_cast %51 : i32 to index
    %c0_21 = arith.constant 0 : index
    %53 = vector.load %arg4[%52, %c0_21] : memref<16x128xf32, #tpu.memory_space<vmem>>, vector<1x128xf32>
    %c6 = arith.constant 6 : index
    %c0_22 = arith.constant 0 : index
    %54 = vector.load %arg6[%c6, %c0_22] : memref<64x128xf32, #tpu.memory_space<vmem>>, vector<1x128xf32>
    tpu.vector_store %arg6[%c6, %c0_22], %53 {strides = array<i32>} : memref<64x128xf32, #tpu.memory_space<vmem>>, vector<1x128xf32>,
    %c8_i32_23 = arith.constant 8 : i32
    %55 = arith.muli %1, %c8_i32_23 : i32
    %c7_i32 = arith.constant 7 : i32
    %56 = arith.addi %55, %c7_i32 : i32
    %57 = arith.index_cast %56 : i32 to index
    %58 = memref.load %arg2[%57] : memref<64xi32, #tpu.memory_space<smem>>
    %59 = arith.index_cast %58 : i32 to index
    %c0_24 = arith.constant 0 : index
    %60 = vector.load %arg4[%59, %c0_24] : memref<16x128xf32, #tpu.memory_space<vmem>>, vector<1x128xf32>
    %c7 = arith.constant 7 : index
    %c0_25 = arith.constant 0 : index
    %61 = vector.load %arg6[%c7, %c0_25] : memref<64x128xf32, #tpu.memory_space<vmem>>, vector<1x128xf32>
    tpu.vector_store %arg6[%c7, %c0_25], %60 {strides = array<i32>} : memref<64x128xf32, #tpu.memory_space<vmem>>, vector<1x128xf32>,
    %c0_26 = arith.constant 0 : index
    %c0_27 = arith.constant 0 : index
    %62 = vector.load %arg6[%c0_26, %c0_27] : memref<64x128xf32, #tpu.memory_space<vmem>>, vector<8x128xf32>
    %63 = vector.broadcast %5 : vector<1x128xf32> to vector<8x128xf32>
    %64 = arith.mulf %62, %63 : vector<8x128xf32>
    %cst = arith.constant dense<0.000000e+00> : vector<8xf32>
    %65 = vector.multi_reduction <add>, %64, %cst [1] : vector<8x128xf32> to vector<8xf32>
    %66 = vector.shape_cast %65 : vector<8xf32> to vector<8x1xf32>
    %cst_28 = arith.constant -2.000000e+01 : f32
    %cst_29 = arith.constant 2.000000e+01 : f32
    %67 = vector.broadcast %cst_28 : f32 to vector<8x1xf32>
    %68 = arith.maximumf %67, %66 : vector<8x1xf32>
    %69 = vector.broadcast %cst_29 : f32 to vector<8x1xf32>
    %70 = arith.minimumf %69, %68 : vector<8x1xf32>
    %71 = tpu.iota {dimensions = array<i32: 0>} : vector<8x1xi32>
    %c0_i32_30 = arith.constant 0 : i32
    %72 = vector.broadcast %c0_i32_30 : i32 to vector<8x1xi32>
    %73 = arith.cmpi eq, %71, %72 : vector<8x1xi32>
    %cst_31 = arith.constant 0.000000e+00 : f32
    %74 = vector.broadcast %cst_31 : f32 to vector<8x1xf32>
    %75 = arith.subf %74, %70 : vector<8x1xf32>
    %cst_32 = arith.constant 0.000000e+00 : f32
    %76 = vector.broadcast %cst_32 : f32 to vector<8x1xf32>
    %77 = arith.maximumf %75, %76 : vector<8x1xf32>
    %78 = math.absf %75 : vector<8x1xf32>
    %cst_33 = arith.constant 0.000000e+00 : f32
    %79 = vector.broadcast %cst_33 : f32 to vector<8x1xf32>
    %80 = arith.subf %79, %78 : vector<8x1xf32>
    %81 = math.exp %80 : vector<8x1xf32>
    %cst_34 = arith.constant 1.000000e+00 : f32
    %82 = vector.broadcast %cst_34 : f32 to vector<8x1xf32>
    %83 = arith.addf %82, %81 : vector<8x1xf32>
    %84 = math.log %83 : vector<8x1xf32>
    %85 = arith.addf %77, %84 : vector<8x1xf32>
    %cst_35 = arith.constant 0.000000e+00 : f32
    %86 = vector.broadcast %cst_35 : f32 to vector<8x1xf32>
    %87 = arith.subf %86, %85 : vector<8x1xf32>
    %cst_36 = arith.constant 0.000000e+00 : f32
    %88 = vector.broadcast %cst_36 : f32 to vector<8x1xf32>
    %89 = arith.maximumf %70, %88 : vector<8x1xf32>
    %90 = math.absf %70 : vector<8x1xf32>
    %cst_37 = arith.constant 0.000000e+00 : f32
    %91 = vector.broadcast %cst_37 : f32 to vector<8x1xf32>
    %92 = arith.subf %91, %90 : vector<8x1xf32>
    %93 = math.exp %92 : vector<8x1xf32>
    %cst_38 = arith.constant 1.000000e+00 : f32
    %94 = vector.broadcast %cst_38 : f32 to vector<8x1xf32>
    %95 = arith.addf %94, %93 : vector<8x1xf32>
    %96 = math.log %95 : vector<8x1xf32>
    %97 = arith.addf %89, %96 : vector<8x1xf32>
    %cst_39 = arith.constant 0.000000e+00 : f32
    %98 = vector.broadcast %cst_39 : f32 to vector<8x1xf32>
    %99 = arith.subf %98, %97 : vector<8x1xf32>
    %100 = arith.select %73, %87, %99 : vector<8x1xi1>, vector<8x1xf32>
    %101 = vector.shape_cast %100 : vector<8x1xf32> to vector<1x8x1xf32>
    %cst_40 = arith.constant dense<0.000000e+00> : vector<1xf32>
    %102 = vector.multi_reduction <add>, %101, %cst_40 [1, 2] : vector<1x8x1xf32> to vector<1xf32>
    %103 = vector.shape_cast %102 : vector<1xf32> to vector<1x1x1xf32>
    %104 = vector.extract %103[0, 0, 0] : f32 from vector<1x1x1xf32>
    %105 = vector.broadcast %104 : f32 to vector<1x1xf32>
    %cst_41 = arith.constant 8.000000e+00 : f32
    %106 = vector.broadcast %cst_41 : f32 to vector<1x1xf32>
    %107 = arith.divf %105, %106 : vector<1x1xf32>
    %cst_42 = arith.constant 0.000000e+00 : f32
    %108 = vector.broadcast %cst_42 : f32 to vector<1x1xf32>
    %109 = arith.subf %108, %107 : vector<1x1xf32>
    %c0_43 = arith.constant 0 : index
    %c0_44 = arith.constant 0 : index
    %110 = vector.load %arg5[%c0_43, %c0_44] : memref<8x1xf32, #tpu.memory_space<vmem>>, vector<1x1xf32>
    tpu.vector_store %arg5[%c0_43, %c0_44], %109 {strides = array<i32>} : memref<8x1xf32, #tpu.memory_space<vmem>>, vector<1x1xf32>,
    %c8_i32_45 = arith.constant 8 : i32
    %111 = arith.muli %arg0, %c8_i32_45 : i32
    %c1_i32_46 = arith.constant 1 : i32
    %112 = arith.addi %111, %c1_i32_46 : i32
    %113 = arith.index_cast %112 : i32 to index
    %114 = memref.load %arg1[%113] : memref<8xi32, #tpu.memory_space<smem>>
    %115 = arith.index_cast %114 : i32 to index
    %c0_47 = arith.constant 0 : index
    %116 = vector.load %arg3[%115, %c0_47] : memref<16x128xf32, #tpu.memory_space<vmem>>, vector<1x128xf32>
    %c8_i32_48 = arith.constant 8 : i32
    %117 = arith.muli %112, %c8_i32_48 : i32
    %c0_i32_49 = arith.constant 0 : i32
    %118 = arith.addi %117, %c0_i32_49 : i32
    %119 = arith.index_cast %118 : i32 to index
    %120 = memref.load %arg2[%119] : memref<64xi32, #tpu.memory_space<smem>>
    %121 = arith.index_cast %120 : i32 to index
    %c0_50 = arith.constant 0 : index
    %122 = vector.load %arg4[%121, %c0_50] : memref<16x128xf32, #tpu.memory_space<vmem>>, vector<1x128xf32>
    %c8 = arith.constant 8 : index
    %c0_51 = arith.constant 0 : index
    %123 = vector.load %arg6[%c8, %c0_51] : memref<64x128xf32, #tpu.memory_space<vmem>>, vector<1x128xf32>
    tpu.vector_store %arg6[%c8, %c0_51], %122 {strides = array<i32>} : memref<64x128xf32, #tpu.memory_space<vmem>>, vector<1x128xf32>,
    %c8_i32_52 = arith.constant 8 : i32
    %124 = arith.muli %112, %c8_i32_52 : i32
    %c1_i32_53 = arith.constant 1 : i32
    %125 = arith.addi %124, %c1_i32_53 : i32
    %126 = arith.index_cast %125 : i32 to index
    %127 = memref.load %arg2[%126] : memref<64xi32, #tpu.memory_space<smem>>
    %128 = arith.index_cast %127 : i32 to index
    %c0_54 = arith.constant 0 : index
    %129 = vector.load %arg4[%128, %c0_54] : memref<16x128xf32, #tpu.memory_space<vmem>>, vector<1x128xf32>
    %c9 = arith.constant 9 : index
    %c0_55 = arith.constant 0 : index
    %130 = vector.load %arg6[%c9, %c0_55] : memref<64x128xf32, #tpu.memory_space<vmem>>, vector<1x128xf32>
    tpu.vector_store %arg6[%c9, %c0_55], %129 {strides = array<i32>} : memref<64x128xf32, #tpu.memory_space<vmem>>, vector<1x128xf32>,
    %c8_i32_56 = arith.constant 8 : i32
    %131 = arith.muli %112, %c8_i32_56 : i32
    %c2_i32_57 = arith.constant 2 : i32
    %132 = arith.addi %131, %c2_i32_57 : i32
    %133 = arith.index_cast %132 : i32 to index
    %134 = memref.load %arg2[%133] : memref<64xi32, #tpu.memory_space<smem>>
    %135 = arith.index_cast %134 : i32 to index
    %c0_58 = arith.constant 0 : index
    %136 = vector.load %arg4[%135, %c0_58] : memref<16x128xf32, #tpu.memory_space<vmem>>, vector<1x128xf32>
    %c10 = arith.constant 10 : index
    %c0_59 = arith.constant 0 : index
    %137 = vector.load %arg6[%c10, %c0_59] : memref<64x128xf32, #tpu.memory_space<vmem>>, vector<1x128xf32>
    tpu.vector_store %arg6[%c10, %c0_59], %136 {strides = array<i32>} : memref<64x128xf32, #tpu.memory_space<vmem>>, vector<1x128xf32>,
    %c8_i32_60 = arith.constant 8 : i32
    %138 = arith.muli %112, %c8_i32_60 : i32
    %c3_i32_61 = arith.constant 3 : i32
    %139 = arith.addi %138, %c3_i32_61 : i32
    %140 = arith.index_cast %139 : i32 to index
    %141 = memref.load %arg2[%140] : memref<64xi32, #tpu.memory_space<smem>>
    %142 = arith.index_cast %141 : i32 to index
    %c0_62 = arith.constant 0 : index
    %143 = vector.load %arg4[%142, %c0_62] : memref<16x128xf32, #tpu.memory_space<vmem>>, vector<1x128xf32>
    %c11 = arith.constant 11 : index
    %c0_63 = arith.constant 0 : index
    %144 = vector.load %arg6[%c11, %c0_63] : memref<64x128xf32, #tpu.memory_space<vmem>>, vector<1x128xf32>
    tpu.vector_store %arg6[%c11, %c0_63], %143 {strides = array<i32>} : memref<64x128xf32, #tpu.memory_space<vmem>>, vector<1x128xf32>,
    %c8_i32_64 = arith.constant 8 : i32
    %145 = arith.muli %112, %c8_i32_64 : i32
    %c4_i32_65 = arith.constant 4 : i32
    %146 = arith.addi %145, %c4_i32_65 : i32
    %147 = arith.index_cast %146 : i32 to index
    %148 = memref.load %arg2[%147] : memref<64xi32, #tpu.memory_space<smem>>
    %149 = arith.index_cast %148 : i32 to index
    %c0_66 = arith.constant 0 : index
    %150 = vector.load %arg4[%149, %c0_66] : memref<16x128xf32, #tpu.memory_space<vmem>>, vector<1x128xf32>
    %c12 = arith.constant 12 : index
    %c0_67 = arith.constant 0 : index
    %151 = vector.load %arg6[%c12, %c0_67] : memref<64x128xf32, #tpu.memory_space<vmem>>, vector<1x128xf32>
    tpu.vector_store %arg6[%c12, %c0_67], %150 {strides = array<i32>} : memref<64x128xf32, #tpu.memory_space<vmem>>, vector<1x128xf32>,
    %c8_i32_68 = arith.constant 8 : i32
    %152 = arith.muli %112, %c8_i32_68 : i32
    %c5_i32_69 = arith.constant 5 : i32
    %153 = arith.addi %152, %c5_i32_69 : i32
    %154 = arith.index_cast %153 : i32 to index
    %155 = memref.load %arg2[%154] : memref<64xi32, #tpu.memory_space<smem>>
    %156 = arith.index_cast %155 : i32 to index
    %c0_70 = arith.constant 0 : index
    %157 = vector.load %arg4[%156, %c0_70] : memref<16x128xf32, #tpu.memory_space<vmem>>, vector<1x128xf32>
    %c13 = arith.constant 13 : index
    %c0_71 = arith.constant 0 : index
    %158 = vector.load %arg6[%c13, %c0_71] : memref<64x128xf32, #tpu.memory_space<vmem>>, vector<1x128xf32>
    tpu.vector_store %arg6[%c13, %c0_71], %157 {strides = array<i32>} : memref<64x128xf32, #tpu.memory_space<vmem>>, vector<1x128xf32>,
    %c8_i32_72 = arith.constant 8 : i32
    %159 = arith.muli %112, %c8_i32_72 : i32
    %c6_i32_73 = arith.constant 6 : i32
    %160 = arith.addi %159, %c6_i32_73 : i32
    %161 = arith.index_cast %160 : i32 to index
    %162 = memref.load %arg2[%161] : memref<64xi32, #tpu.memory_space<smem>>
    %163 = arith.index_cast %162 : i32 to index
    %c0_74 = arith.constant 0 : index
    %164 = vector.load %arg4[%163, %c0_74] : memref<16x128xf32, #tpu.memory_space<vmem>>, vector<1x128xf32>
    %c14 = arith.constant 14 : index
    %c0_75 = arith.constant 0 : index
    %165 = vector.load %arg6[%c14, %c0_75] : memref<64x128xf32, #tpu.memory_space<vmem>>, vector<1x128xf32>
    tpu.vector_store %arg6[%c14, %c0_75], %164 {strides = array<i32>} : memref<64x128xf32, #tpu.memory_space<vmem>>, vector<1x128xf32>,
    %c8_i32_76 = arith.constant 8 : i32
    %166 = arith.muli %112, %c8_i32_76 : i32
    %c7_i32_77 = arith.constant 7 : i32
    %167 = arith.addi %166, %c7_i32_77 : i32
    %168 = arith.index_cast %167 : i32 to index
    %169 = memref.load %arg2[%168] : memref<64xi32, #tpu.memory_space<smem>>
    %170 = arith.index_cast %169 : i32 to index
    %c0_78 = arith.constant 0 : index
    %171 = vector.load %arg4[%170, %c0_78] : memref<16x128xf32, #tpu.memory_space<vmem>>, vector<1x128xf32>
    %c15 = arith.constant 15 : index
    %c0_79 = arith.constant 0 : index
    %172 = vector.load %arg6[%c15, %c0_79] : memref<64x128xf32, #tpu.memory_space<vmem>>, vector<1x128xf32>
    tpu.vector_store %arg6[%c15, %c0_79], %171 {strides = array<i32>} : memref<64x128xf32, #tpu.memory_space<vmem>>, vector<1x128xf32>,
    %c8_80 = arith.constant 8 : index
    %c0_81 = arith.constant 0 : index
    %173 = vector.load %arg6[%c8_80, %c0_81] : memref<64x128xf32, #tpu.memory_space<vmem>>, vector<8x128xf32>
    %174 = vector.broadcast %116 : vector<1x128xf32> to vector<8x128xf32>
    %175 = arith.mulf %173, %174 : vector<8x128xf32>
    %cst_82 = arith.constant dense<0.000000e+00> : vector<8xf32>
    %176 = vector.multi_reduction <add>, %175, %cst_82 [1] : vector<8x128xf32> to vector<8xf32>
    %177 = vector.shape_cast %176 : vector<8xf32> to vector<8x1xf32>
    %cst_83 = arith.constant -2.000000e+01 : f32
    %cst_84 = arith.constant 2.000000e+01 : f32
    %178 = vector.broadcast %cst_83 : f32 to vector<8x1xf32>
    %179 = arith.maximumf %178, %177 : vector<8x1xf32>
    %180 = vector.broadcast %cst_84 : f32 to vector<8x1xf32>
    %181 = arith.minimumf %180, %179 : vector<8x1xf32>
    %182 = tpu.iota {dimensions = array<i32: 0>} : vector<8x1xi32>
    %c0_i32_85 = arith.constant 0 : i32
    %183 = vector.broadcast %c0_i32_85 : i32 to vector<8x1xi32>
    %184 = arith.cmpi eq, %182, %183 : vector<8x1xi32>
    %cst_86 = arith.constant 0.000000e+00 : f32
    %185 = vector.broadcast %cst_86 : f32 to vector<8x1xf32>
    %186 = arith.subf %185, %181 : vector<8x1xf32>
    %cst_87 = arith.constant 0.000000e+00 : f32
    %187 = vector.broadcast %cst_87 : f32 to vector<8x1xf32>
    %188 = arith.maximumf %186, %187 : vector<8x1xf32>
    %189 = math.absf %186 : vector<8x1xf32>
    %cst_88 = arith.constant 0.000000e+00 : f32
    %190 = vector.broadcast %cst_88 : f32 to vector<8x1xf32>
    %191 = arith.subf %190, %189 : vector<8x1xf32>
    %192 = math.exp %191 : vector<8x1xf32>
    %cst_89 = arith.constant 1.000000e+00 : f32
    %193 = vector.broadcast %cst_89 : f32 to vector<8x1xf32>
    %194 = arith.addf %193, %192 : vector<8x1xf32>
    %195 = math.log %194 : vector<8x1xf32>
    %196 = arith.addf %188, %195 : vector<8x1xf32>
    %cst_90 = arith.constant 0.000000e+00 : f32
    %197 = vector.broadcast %cst_90 : f32 to vector<8x1xf32>
    %198 = arith.subf %197, %196 : vector<8x1xf32>
    %cst_91 = arith.constant 0.000000e+00 : f32
    %199 = vector.broadcast %cst_91 : f32 to vector<8x1xf32>
    %200 = arith.maximumf %181, %199 : vector<8x1xf32>
    %201 = math.absf %181 : vector<8x1xf32>
    %cst_92 = arith.constant 0.000000e+00 : f32
    %202 = vector.broadcast %cst_92 : f32 to vector<8x1xf32>
    %203 = arith.subf %202, %201 : vector<8x1xf32>
    %204 = math.exp %203 : vector<8x1xf32>
    %cst_93 = arith.constant 1.000000e+00 : f32
    %205 = vector.broadcast %cst_93 : f32 to vector<8x1xf32>
    %206 = arith.addf %205, %204 : vector<8x1xf32>
    %207 = math.log %206 : vector<8x1xf32>
    %208 = arith.addf %200, %207 : vector<8x1xf32>
    %cst_94 = arith.constant 0.000000e+00 : f32
    %209 = vector.broadcast %cst_94 : f32 to vector<8x1xf32>
    %210 = arith.subf %209, %208 : vector<8x1xf32>
    %211 = arith.select %184, %198, %210 : vector<8x1xi1>, vector<8x1xf32>
    %212 = vector.shape_cast %211 : vector<8x1xf32> to vector<1x8x1xf32>
    %cst_95 = arith.constant dense<0.000000e+00> : vector<1xf32>
    %213 = vector.multi_reduction <add>, %212, %cst_95 [1, 2] : vector<1x8x1xf32> to vector<1xf32>
    %214 = vector.shape_cast %213 : vector<1xf32> to vector<1x1x1xf32>
    %215 = vector.extract %214[0, 0, 0] : f32 from vector<1x1x1xf32>
    %216 = vector.broadcast %215 : f32 to vector<1x1xf32>
    %cst_96 = arith.constant 8.000000e+00 : f32
    %217 = vector.broadcast %cst_96 : f32 to vector<1x1xf32>
    %218 = arith.divf %216, %217 : vector<1x1xf32>
    %cst_97 = arith.constant 0.000000e+00 : f32
    %219 = vector.broadcast %cst_97 : f32 to vector<1x1xf32>
    %220 = arith.subf %219, %218 : vector<1x1xf32>
    %c1_98 = arith.constant 1 : index
    %c0_99 = arith.constant 0 : index
    %221 = vector.load %arg5[%c1_98, %c0_99] : memref<8x1xf32, #tpu.memory_space<vmem>>, vector<1x1xf32>
    tpu.vector_store %arg5[%c1_98, %c0_99], %220 {strides = array<i32>} : memref<8x1xf32, #tpu.memory_space<vmem>>, vector<1x1xf32>,
    %c8_i32_100 = arith.constant 8 : i32
    %222 = arith.muli %arg0, %c8_i32_100 : i32
    %c2_i32_101 = arith.constant 2 : i32
    %223 = arith.addi %222, %c2_i32_101 : i32
    %224 = arith.index_cast %223 : i32 to index
    %225 = memref.load %arg1[%224] : memref<8xi32, #tpu.memory_space<smem>>
    %226 = arith.index_cast %225 : i32 to index
    %c0_102 = arith.constant 0 : index
    %227 = vector.load %arg3[%226, %c0_102] : memref<16x128xf32, #tpu.memory_space<vmem>>, vector<1x128xf32>
    %c8_i32_103 = arith.constant 8 : i32
    %228 = arith.muli %223, %c8_i32_103 : i32
    %c0_i32_104 = arith.constant 0 : i32
    %229 = arith.addi %228, %c0_i32_104 : i32
    %230 = arith.index_cast %229 : i32 to index
    %231 = memref.load %arg2[%230] : memref<64xi32, #tpu.memory_space<smem>>
    %232 = arith.index_cast %231 : i32 to index
    %c0_105 = arith.constant 0 : index
    %233 = vector.load %arg4[%232, %c0_105] : memref<16x128xf32, #tpu.memory_space<vmem>>, vector<1x128xf32>
    %c16 = arith.constant 16 : index
    %c0_106 = arith.constant 0 : index
    %234 = vector.load %arg6[%c16, %c0_106] : memref<64x128xf32, #tpu.memory_space<vmem>>, vector<1x128xf32>
    tpu.vector_store %arg6[%c16, %c0_106], %233 {strides = array<i32>} : memref<64x128xf32, #tpu.memory_space<vmem>>, vector<1x128xf32>,
    %c8_i32_107 = arith.constant 8 : i32
    %235 = arith.muli %223, %c8_i32_107 : i32
    %c1_i32_108 = arith.constant 1 : i32
    %236 = arith.addi %235, %c1_i32_108 : i32
    %237 = arith.index_cast %236 : i32 to index
    %238 = memref.load %arg2[%237] : memref<64xi32, #tpu.memory_space<smem>>
    %239 = arith.index_cast %238 : i32 to index
    %c0_109 = arith.constant 0 : index
    %240 = vector.load %arg4[%239, %c0_109] : memref<16x128xf32, #tpu.memory_space<vmem>>, vector<1x128xf32>
    %c17 = arith.constant 17 : index
    %c0_110 = arith.constant 0 : index
    %241 = vector.load %arg6[%c17, %c0_110] : memref<64x128xf32, #tpu.memory_space<vmem>>, vector<1x128xf32>
    tpu.vector_store %arg6[%c17, %c0_110], %240 {strides = array<i32>} : memref<64x128xf32, #tpu.memory_space<vmem>>, vector<1x128xf32>,
    %c8_i32_111 = arith.constant 8 : i32
    %242 = arith.muli %223, %c8_i32_111 : i32
    %c2_i32_112 = arith.constant 2 : i32
    %243 = arith.addi %242, %c2_i32_112 : i32
    %244 = arith.index_cast %243 : i32 to index
    %245 = memref.load %arg2[%244] : memref<64xi32, #tpu.memory_space<smem>>
    %246 = arith.index_cast %245 : i32 to index
    %c0_113 = arith.constant 0 : index
    %247 = vector.load %arg4[%246, %c0_113] : memref<16x128xf32, #tpu.memory_space<vmem>>, vector<1x128xf32>
    %c18 = arith.constant 18 : index
    %c0_114 = arith.constant 0 : index
    %248 = vector.load %arg6[%c18, %c0_114] : memref<64x128xf32, #tpu.memory_space<vmem>>, vector<1x128xf32>
    tpu.vector_store %arg6[%c18, %c0_114], %247 {strides = array<i32>} : memref<64x128xf32, #tpu.memory_space<vmem>>, vector<1x128xf32>,
    %c8_i32_115 = arith.constant 8 : i32
    %249 = arith.muli %223, %c8_i32_115 : i32
    %c3_i32_116 = arith.constant 3 : i32
    %250 = arith.addi %249, %c3_i32_116 : i32
    %251 = arith.index_cast %250 : i32 to index
    %252 = memref.load %arg2[%251] : memref<64xi32, #tpu.memory_space<smem>>
    %253 = arith.index_cast %252 : i32 to index
    %c0_117 = arith.constant 0 : index
    %254 = vector.load %arg4[%253, %c0_117] : memref<16x128xf32, #tpu.memory_space<vmem>>, vector<1x128xf32>
    %c19 = arith.constant 19 : index
    %c0_118 = arith.constant 0 : index
    %255 = vector.load %arg6[%c19, %c0_118] : memref<64x128xf32, #tpu.memory_space<vmem>>, vector<1x128xf32>
    tpu.vector_store %arg6[%c19, %c0_118], %254 {strides = array<i32>} : memref<64x128xf32, #tpu.memory_space<vmem>>, vector<1x128xf32>,
    %c8_i32_119 = arith.constant 8 : i32
    %256 = arith.muli %223, %c8_i32_119 : i32
    %c4_i32_120 = arith.constant 4 : i32
    %257 = arith.addi %256, %c4_i32_120 : i32
    %258 = arith.index_cast %257 : i32 to index
    %259 = memref.load %arg2[%258] : memref<64xi32, #tpu.memory_space<smem>>
    %260 = arith.index_cast %259 : i32 to index
    %c0_121 = arith.constant 0 : index
    %261 = vector.load %arg4[%260, %c0_121] : memref<16x128xf32, #tpu.memory_space<vmem>>, vector<1x128xf32>
    %c20 = arith.constant 20 : index
    %c0_122 = arith.constant 0 : index
    %262 = vector.load %arg6[%c20, %c0_122] : memref<64x128xf32, #tpu.memory_space<vmem>>, vector<1x128xf32>
    tpu.vector_store %arg6[%c20, %c0_122], %261 {strides = array<i32>} : memref<64x128xf32, #tpu.memory_space<vmem>>, vector<1x128xf32>,
    %c8_i32_123 = arith.constant 8 : i32
    %263 = arith.muli %223, %c8_i32_123 : i32
    %c5_i32_124 = arith.constant 5 : i32
    %264 = arith.addi %263, %c5_i32_124 : i32
    %265 = arith.index_cast %264 : i32 to index
    %266 = memref.load %arg2[%265] : memref<64xi32, #tpu.memory_space<smem>>
    %267 = arith.index_cast %266 : i32 to index
    %c0_125 = arith.constant 0 : index
    %268 = vector.load %arg4[%267, %c0_125] : memref<16x128xf32, #tpu.memory_space<vmem>>, vector<1x128xf32>
    %c21 = arith.constant 21 : index
    %c0_126 = arith.constant 0 : index
    %269 = vector.load %arg6[%c21, %c0_126] : memref<64x128xf32, #tpu.memory_space<vmem>>, vector<1x128xf32>
    tpu.vector_store %arg6[%c21, %c0_126], %268 {strides = array<i32>} : memref<64x128xf32, #tpu.memory_space<vmem>>, vector<1x128xf32>,
    %c8_i32_127 = arith.constant 8 : i32
    %270 = arith.muli %223, %c8_i32_127 : i32
    %c6_i32_128 = arith.constant 6 : i32
    %271 = arith.addi %270, %c6_i32_128 : i32
    %272 = arith.index_cast %271 : i32 to index
    %273 = memref.load %arg2[%272] : memref<64xi32, #tpu.memory_space<smem>>
    %274 = arith.index_cast %273 : i32 to index
    %c0_129 = arith.constant 0 : index
    %275 = vector.load %arg4[%274, %c0_129] : memref<16x128xf32, #tpu.memory_space<vmem>>, vector<1x128xf32>
    %c22 = arith.constant 22 : index
    %c0_130 = arith.constant 0 : index
    %276 = vector.load %arg6[%c22, %c0_130] : memref<64x128xf32, #tpu.memory_space<vmem>>, vector<1x128xf32>
    tpu.vector_store %arg6[%c22, %c0_130], %275 {strides = array<i32>} : memref<64x128xf32, #tpu.memory_space<vmem>>, vector<1x128xf32>,
    %c8_i32_131 = arith.constant 8 : i32
    %277 = arith.muli %223, %c8_i32_131 : i32
    %c7_i32_132 = arith.constant 7 : i32
    %278 = arith.addi %277, %c7_i32_132 : i32
    %279 = arith.index_cast %278 : i32 to index
    %280 = memref.load %arg2[%279] : memref<64xi32, #tpu.memory_space<smem>>
    %281 = arith.index_cast %280 : i32 to index
    %c0_133 = arith.constant 0 : index
    %282 = vector.load %arg4[%281, %c0_133] : memref<16x128xf32, #tpu.memory_space<vmem>>, vector<1x128xf32>
    %c23 = arith.constant 23 : index
    %c0_134 = arith.constant 0 : index
    %283 = vector.load %arg6[%c23, %c0_134] : memref<64x128xf32, #tpu.memory_space<vmem>>, vector<1x128xf32>
    tpu.vector_store %arg6[%c23, %c0_134], %282 {strides = array<i32>} : memref<64x128xf32, #tpu.memory_space<vmem>>, vector<1x128xf32>,
    %c16_135 = arith.constant 16 : index
    %c0_136 = arith.constant 0 : index
    %284 = vector.load %arg6[%c16_135, %c0_136] : memref<64x128xf32, #tpu.memory_space<vmem>>, vector<8x128xf32>
    %285 = vector.broadcast %227 : vector<1x128xf32> to vector<8x128xf32>
    %286 = arith.mulf %284, %285 : vector<8x128xf32>
    %cst_137 = arith.constant dense<0.000000e+00> : vector<8xf32>
    %287 = vector.multi_reduction <add>, %286, %cst_137 [1] : vector<8x128xf32> to vector<8xf32>
    %288 = vector.shape_cast %287 : vector<8xf32> to vector<8x1xf32>
    %cst_138 = arith.constant -2.000000e+01 : f32
    %cst_139 = arith.constant 2.000000e+01 : f32
    %289 = vector.broadcast %cst_138 : f32 to vector<8x1xf32>
    %290 = arith.maximumf %289, %288 : vector<8x1xf32>
    %291 = vector.broadcast %cst_139 : f32 to vector<8x1xf32>
    %292 = arith.minimumf %291, %290 : vector<8x1xf32>
    %293 = tpu.iota {dimensions = array<i32: 0>} : vector<8x1xi32>
    %c0_i32_140 = arith.constant 0 : i32
    %294 = vector.broadcast %c0_i32_140 : i32 to vector<8x1xi32>
    %295 = arith.cmpi eq, %293, %294 : vector<8x1xi32>
    %cst_141 = arith.constant 0.000000e+00 : f32
    %296 = vector.broadcast %cst_141 : f32 to vector<8x1xf32>
    %297 = arith.subf %296, %292 : vector<8x1xf32>
    %cst_142 = arith.constant 0.000000e+00 : f32
    %298 = vector.broadcast %cst_142 : f32 to vector<8x1xf32>
    %299 = arith.maximumf %297, %298 : vector<8x1xf32>
    %300 = math.absf %297 : vector<8x1xf32>
    %cst_143 = arith.constant 0.000000e+00 : f32
    %301 = vector.broadcast %cst_143 : f32 to vector<8x1xf32>
    %302 = arith.subf %301, %300 : vector<8x1xf32>
    %303 = math.exp %302 : vector<8x1xf32>
    %cst_144 = arith.constant 1.000000e+00 : f32
    %304 = vector.broadcast %cst_144 : f32 to vector<8x1xf32>
    %305 = arith.addf %304, %303 : vector<8x1xf32>
    %306 = math.log %305 : vector<8x1xf32>
    %307 = arith.addf %299, %306 : vector<8x1xf32>
    %cst_145 = arith.constant 0.000000e+00 : f32
    %308 = vector.broadcast %cst_145 : f32 to vector<8x1xf32>
    %309 = arith.subf %308, %307 : vector<8x1xf32>
    %cst_146 = arith.constant 0.000000e+00 : f32
    %310 = vector.broadcast %cst_146 : f32 to vector<8x1xf32>
    %311 = arith.maximumf %292, %310 : vector<8x1xf32>
    %312 = math.absf %292 : vector<8x1xf32>
    %cst_147 = arith.constant 0.000000e+00 : f32
    %313 = vector.broadcast %cst_147 : f32 to vector<8x1xf32>
    %314 = arith.subf %313, %312 : vector<8x1xf32>
    %315 = math.exp %314 : vector<8x1xf32>
    %cst_148 = arith.constant 1.000000e+00 : f32
    %316 = vector.broadcast %cst_148 : f32 to vector<8x1xf32>
    %317 = arith.addf %316, %315 : vector<8x1xf32>
    %318 = math.log %317 : vector<8x1xf32>
    %319 = arith.addf %311, %318 : vector<8x1xf32>
    %cst_149 = arith.constant 0.000000e+00 : f32
    %320 = vector.broadcast %cst_149 : f32 to vector<8x1xf32>
    %321 = arith.subf %320, %319 : vector<8x1xf32>
    %322 = arith.select %295, %309, %321 : vector<8x1xi1>, vector<8x1xf32>
    %323 = vector.shape_cast %322 : vector<8x1xf32> to vector<1x8x1xf32>
    %cst_150 = arith.constant dense<0.000000e+00> : vector<1xf32>
    %324 = vector.multi_reduction <add>, %323, %cst_150 [1, 2] : vector<1x8x1xf32> to vector<1xf32>
    %325 = vector.shape_cast %324 : vector<1xf32> to vector<1x1x1xf32>
    %326 = vector.extract %325[0, 0, 0] : f32 from vector<1x1x1xf32>
    %327 = vector.broadcast %326 : f32 to vector<1x1xf32>
    %cst_151 = arith.constant 8.000000e+00 : f32
    %328 = vector.broadcast %cst_151 : f32 to vector<1x1xf32>
    %329 = arith.divf %327, %328 : vector<1x1xf32>
    %cst_152 = arith.constant 0.000000e+00 : f32
    %330 = vector.broadcast %cst_152 : f32 to vector<1x1xf32>
    %331 = arith.subf %330, %329 : vector<1x1xf32>
    %c2_153 = arith.constant 2 : index
    %c0_154 = arith.constant 0 : index
    %332 = vector.load %arg5[%c2_153, %c0_154] : memref<8x1xf32, #tpu.memory_space<vmem>>, vector<1x1xf32>
    tpu.vector_store %arg5[%c2_153, %c0_154], %331 {strides = array<i32>} : memref<8x1xf32, #tpu.memory_space<vmem>>, vector<1x1xf32>,
    %c8_i32_155 = arith.constant 8 : i32
    %333 = arith.muli %arg0, %c8_i32_155 : i32
    %c3_i32_156 = arith.constant 3 : i32
    %334 = arith.addi %333, %c3_i32_156 : i32
    %335 = arith.index_cast %334 : i32 to index
    %336 = memref.load %arg1[%335] : memref<8xi32, #tpu.memory_space<smem>>
    %337 = arith.index_cast %336 : i32 to index
    %c0_157 = arith.constant 0 : index
    %338 = vector.load %arg3[%337, %c0_157] : memref<16x128xf32, #tpu.memory_space<vmem>>, vector<1x128xf32>
    %c8_i32_158 = arith.constant 8 : i32
    %339 = arith.muli %334, %c8_i32_158 : i32
    %c0_i32_159 = arith.constant 0 : i32
    %340 = arith.addi %339, %c0_i32_159 : i32
    %341 = arith.index_cast %340 : i32 to index
    %342 = memref.load %arg2[%341] : memref<64xi32, #tpu.memory_space<smem>>
    %343 = arith.index_cast %342 : i32 to index
    %c0_160 = arith.constant 0 : index
    %344 = vector.load %arg4[%343, %c0_160] : memref<16x128xf32, #tpu.memory_space<vmem>>, vector<1x128xf32>
    %c24 = arith.constant 24 : index
    %c0_161 = arith.constant 0 : index
    %345 = vector.load %arg6[%c24, %c0_161] : memref<64x128xf32, #tpu.memory_space<vmem>>, vector<1x128xf32>
    tpu.vector_store %arg6[%c24, %c0_161], %344 {strides = array<i32>} : memref<64x128xf32, #tpu.memory_space<vmem>>, vector<1x128xf32>,
    %c8_i32_162 = arith.constant 8 : i32
    %346 = arith.muli %334, %c8_i32_162 : i32
    %c1_i32_163 = arith.constant 1 : i32
    %347 = arith.addi %346, %c1_i32_163 : i32
    %348 = arith.index_cast %347 : i32 to index
    %349 = memref.load %arg2[%348] : memref<64xi32, #tpu.memory_space<smem>>
    %350 = arith.index_cast %349 : i32 to index
    %c0_164 = arith.constant 0 : index
    %351 = vector.load %arg4[%350, %c0_164] : memref<16x128xf32, #tpu.memory_space<vmem>>, vector<1x128xf32>
    %c25 = arith.constant 25 : index
    %c0_165 = arith.constant 0 : index
    %352 = vector.load %arg6[%c25, %c0_165] : memref<64x128xf32, #tpu.memory_space<vmem>>, vector<1x128xf32>
    tpu.vector_store %arg6[%c25, %c0_165], %351 {strides = array<i32>} : memref<64x128xf32, #tpu.memory_space<vmem>>, vector<1x128xf32>,
    %c8_i32_166 = arith.constant 8 : i32
    %353 = arith.muli %334, %c8_i32_166 : i32
    %c2_i32_167 = arith.constant 2 : i32
    %354 = arith.addi %353, %c2_i32_167 : i32
    %355 = arith.index_cast %354 : i32 to index
    %356 = memref.load %arg2[%355] : memref<64xi32, #tpu.memory_space<smem>>
    %357 = arith.index_cast %356 : i32 to index
    %c0_168 = arith.constant 0 : index
    %358 = vector.load %arg4[%357, %c0_168] : memref<16x128xf32, #tpu.memory_space<vmem>>, vector<1x128xf32>
    %c26 = arith.constant 26 : index
    %c0_169 = arith.constant 0 : index
    %359 = vector.load %arg6[%c26, %c0_169] : memref<64x128xf32, #tpu.memory_space<vmem>>, vector<1x128xf32>
    tpu.vector_store %arg6[%c26, %c0_169], %358 {strides = array<i32>} : memref<64x128xf32, #tpu.memory_space<vmem>>, vector<1x128xf32>,
    %c8_i32_170 = arith.constant 8 : i32
    %360 = arith.muli %334, %c8_i32_170 : i32
    %c3_i32_171 = arith.constant 3 : i32
    %361 = arith.addi %360, %c3_i32_171 : i32
    %362 = arith.index_cast %361 : i32 to index
    %363 = memref.load %arg2[%362] : memref<64xi32, #tpu.memory_space<smem>>
    %364 = arith.index_cast %363 : i32 to index
    %c0_172 = arith.constant 0 : index
    %365 = vector.load %arg4[%364, %c0_172] : memref<16x128xf32, #tpu.memory_space<vmem>>, vector<1x128xf32>
    %c27 = arith.constant 27 : index
    %c0_173 = arith.constant 0 : index
    %366 = vector.load %arg6[%c27, %c0_173] : memref<64x128xf32, #tpu.memory_space<vmem>>, vector<1x128xf32>
    tpu.vector_store %arg6[%c27, %c0_173], %365 {strides = array<i32>} : memref<64x128xf32, #tpu.memory_space<vmem>>, vector<1x128xf32>,
    %c8_i32_174 = arith.constant 8 : i32
    %367 = arith.muli %334, %c8_i32_174 : i32
    %c4_i32_175 = arith.constant 4 : i32
    %368 = arith.addi %367, %c4_i32_175 : i32
    %369 = arith.index_cast %368 : i32 to index
    %370 = memref.load %arg2[%369] : memref<64xi32, #tpu.memory_space<smem>>
    %371 = arith.index_cast %370 : i32 to index
    %c0_176 = arith.constant 0 : index
    %372 = vector.load %arg4[%371, %c0_176] : memref<16x128xf32, #tpu.memory_space<vmem>>, vector<1x128xf32>
    %c28 = arith.constant 28 : index
    %c0_177 = arith.constant 0 : index
    %373 = vector.load %arg6[%c28, %c0_177] : memref<64x128xf32, #tpu.memory_space<vmem>>, vector<1x128xf32>
    tpu.vector_store %arg6[%c28, %c0_177], %372 {strides = array<i32>} : memref<64x128xf32, #tpu.memory_space<vmem>>, vector<1x128xf32>,
    %c8_i32_178 = arith.constant 8 : i32
    %374 = arith.muli %334, %c8_i32_178 : i32
    %c5_i32_179 = arith.constant 5 : i32
    %375 = arith.addi %374, %c5_i32_179 : i32
    %376 = arith.index_cast %375 : i32 to index
    %377 = memref.load %arg2[%376] : memref<64xi32, #tpu.memory_space<smem>>
    %378 = arith.index_cast %377 : i32 to index
    %c0_180 = arith.constant 0 : index
    %379 = vector.load %arg4[%378, %c0_180] : memref<16x128xf32, #tpu.memory_space<vmem>>, vector<1x128xf32>
    %c29 = arith.constant 29 : index
    %c0_181 = arith.constant 0 : index
    %380 = vector.load %arg6[%c29, %c0_181] : memref<64x128xf32, #tpu.memory_space<vmem>>, vector<1x128xf32>
    tpu.vector_store %arg6[%c29, %c0_181], %379 {strides = array<i32>} : memref<64x128xf32, #tpu.memory_space<vmem>>, vector<1x128xf32>,
    %c8_i32_182 = arith.constant 8 : i32
    %381 = arith.muli %334, %c8_i32_182 : i32
    %c6_i32_183 = arith.constant 6 : i32
    %382 = arith.addi %381, %c6_i32_183 : i32
    %383 = arith.index_cast %382 : i32 to index
    %384 = memref.load %arg2[%383] : memref<64xi32, #tpu.memory_space<smem>>
    %385 = arith.index_cast %384 : i32 to index
    %c0_184 = arith.constant 0 : index
    %386 = vector.load %arg4[%385, %c0_184] : memref<16x128xf32, #tpu.memory_space<vmem>>, vector<1x128xf32>
    %c30 = arith.constant 30 : index
    %c0_185 = arith.constant 0 : index
    %387 = vector.load %arg6[%c30, %c0_185] : memref<64x128xf32, #tpu.memory_space<vmem>>, vector<1x128xf32>
    tpu.vector_store %arg6[%c30, %c0_185], %386 {strides = array<i32>} : memref<64x128xf32, #tpu.memory_space<vmem>>, vector<1x128xf32>,
    %c8_i32_186 = arith.constant 8 : i32
    %388 = arith.muli %334, %c8_i32_186 : i32
    %c7_i32_187 = arith.constant 7 : i32
    %389 = arith.addi %388, %c7_i32_187 : i32
    %390 = arith.index_cast %389 : i32 to index
    %391 = memref.load %arg2[%390] : memref<64xi32, #tpu.memory_space<smem>>
    %392 = arith.index_cast %391 : i32 to index
    %c0_188 = arith.constant 0 : index
    %393 = vector.load %arg4[%392, %c0_188] : memref<16x128xf32, #tpu.memory_space<vmem>>, vector<1x128xf32>
    %c31 = arith.constant 31 : index
    %c0_189 = arith.constant 0 : index
    %394 = vector.load %arg6[%c31, %c0_189] : memref<64x128xf32, #tpu.memory_space<vmem>>, vector<1x128xf32>
    tpu.vector_store %arg6[%c31, %c0_189], %393 {strides = array<i32>} : memref<64x128xf32, #tpu.memory_space<vmem>>, vector<1x128xf32>,
    %c24_190 = arith.constant 24 : index
    %c0_191 = arith.constant 0 : index
    %395 = vector.load %arg6[%c24_190, %c0_191] : memref<64x128xf32, #tpu.memory_space<vmem>>, vector<8x128xf32>
    %396 = vector.broadcast %338 : vector<1x128xf32> to vector<8x128xf32>
    %397 = arith.mulf %395, %396 : vector<8x128xf32>
    %cst_192 = arith.constant dense<0.000000e+00> : vector<8xf32>
    %398 = vector.multi_reduction <add>, %397, %cst_192 [1] : vector<8x128xf32> to vector<8xf32>
    %399 = vector.shape_cast %398 : vector<8xf32> to vector<8x1xf32>
    %cst_193 = arith.constant -2.000000e+01 : f32
    %cst_194 = arith.constant 2.000000e+01 : f32
    %400 = vector.broadcast %cst_193 : f32 to vector<8x1xf32>
    %401 = arith.maximumf %400, %399 : vector<8x1xf32>
    %402 = vector.broadcast %cst_194 : f32 to vector<8x1xf32>
    %403 = arith.minimumf %402, %401 : vector<8x1xf32>
    %404 = tpu.iota {dimensions = array<i32: 0>} : vector<8x1xi32>
    %c0_i32_195 = arith.constant 0 : i32
    %405 = vector.broadcast %c0_i32_195 : i32 to vector<8x1xi32>
    %406 = arith.cmpi eq, %404, %405 : vector<8x1xi32>
    %cst_196 = arith.constant 0.000000e+00 : f32
    %407 = vector.broadcast %cst_196 : f32 to vector<8x1xf32>
    %408 = arith.subf %407, %403 : vector<8x1xf32>
    %cst_197 = arith.constant 0.000000e+00 : f32
    %409 = vector.broadcast %cst_197 : f32 to vector<8x1xf32>
    %410 = arith.maximumf %408, %409 : vector<8x1xf32>
    %411 = math.absf %408 : vector<8x1xf32>
    %cst_198 = arith.constant 0.000000e+00 : f32
    %412 = vector.broadcast %cst_198 : f32 to vector<8x1xf32>
    %413 = arith.subf %412, %411 : vector<8x1xf32>
    %414 = math.exp %413 : vector<8x1xf32>
    %cst_199 = arith.constant 1.000000e+00 : f32
    %415 = vector.broadcast %cst_199 : f32 to vector<8x1xf32>
    %416 = arith.addf %415, %414 : vector<8x1xf32>
    %417 = math.log %416 : vector<8x1xf32>
    %418 = arith.addf %410, %417 : vector<8x1xf32>
    %cst_200 = arith.constant 0.000000e+00 : f32
    %419 = vector.broadcast %cst_200 : f32 to vector<8x1xf32>
    %420 = arith.subf %419, %418 : vector<8x1xf32>
    %cst_201 = arith.constant 0.000000e+00 : f32
    %421 = vector.broadcast %cst_201 : f32 to vector<8x1xf32>
    %422 = arith.maximumf %403, %421 : vector<8x1xf32>
    %423 = math.absf %403 : vector<8x1xf32>
    %cst_202 = arith.constant 0.000000e+00 : f32
    %424 = vector.broadcast %cst_202 : f32 to vector<8x1xf32>
    %425 = arith.subf %424, %423 : vector<8x1xf32>
    %426 = math.exp %425 : vector<8x1xf32>
    %cst_203 = arith.constant 1.000000e+00 : f32
    %427 = vector.broadcast %cst_203 : f32 to vector<8x1xf32>
    %428 = arith.addf %427, %426 : vector<8x1xf32>
    %429 = math.log %428 : vector<8x1xf32>
    %430 = arith.addf %422, %429 : vector<8x1xf32>
    %cst_204 = arith.constant 0.000000e+00 : f32
    %431 = vector.broadcast %cst_204 : f32 to vector<8x1xf32>
    %432 = arith.subf %431, %430 : vector<8x1xf32>
    %433 = arith.select %406, %420, %432 : vector<8x1xi1>, vector<8x1xf32>
    %434 = vector.shape_cast %433 : vector<8x1xf32> to vector<1x8x1xf32>
    %cst_205 = arith.constant dense<0.000000e+00> : vector<1xf32>
    %435 = vector.multi_reduction <add>, %434, %cst_205 [1, 2] : vector<1x8x1xf32> to vector<1xf32>
    %436 = vector.shape_cast %435 : vector<1xf32> to vector<1x1x1xf32>
    %437 = vector.extract %436[0, 0, 0] : f32 from vector<1x1x1xf32>
    %438 = vector.broadcast %437 : f32 to vector<1x1xf32>
    %cst_206 = arith.constant 8.000000e+00 : f32
    %439 = vector.broadcast %cst_206 : f32 to vector<1x1xf32>
    %440 = arith.divf %438, %439 : vector<1x1xf32>
    %cst_207 = arith.constant 0.000000e+00 : f32
    %441 = vector.broadcast %cst_207 : f32 to vector<1x1xf32>
    %442 = arith.subf %441, %440 : vector<1x1xf32>
    %c3_208 = arith.constant 3 : index
    %c0_209 = arith.constant 0 : index
    %443 = vector.load %arg5[%c3_208, %c0_209] : memref<8x1xf32, #tpu.memory_space<vmem>>, vector<1x1xf32>
    tpu.vector_store %arg5[%c3_208, %c0_209], %442 {strides = array<i32>} : memref<8x1xf32, #tpu.memory_space<vmem>>, vector<1x1xf32>,
    %c8_i32_210 = arith.constant 8 : i32
    %444 = arith.muli %arg0, %c8_i32_210 : i32
    %c4_i32_211 = arith.constant 4 : i32
    %445 = arith.addi %444, %c4_i32_211 : i32
    %446 = arith.index_cast %445 : i32 to index
    %447 = memref.load %arg1[%446] : memref<8xi32, #tpu.memory_space<smem>>
    %448 = arith.index_cast %447 : i32 to index
    %c0_212 = arith.constant 0 : index
    %449 = vector.load %arg3[%448, %c0_212] : memref<16x128xf32, #tpu.memory_space<vmem>>, vector<1x128xf32>
    %c8_i32_213 = arith.constant 8 : i32
    %450 = arith.muli %445, %c8_i32_213 : i32
    %c0_i32_214 = arith.constant 0 : i32
    %451 = arith.addi %450, %c0_i32_214 : i32
    %452 = arith.index_cast %451 : i32 to index
    %453 = memref.load %arg2[%452] : memref<64xi32, #tpu.memory_space<smem>>
    %454 = arith.index_cast %453 : i32 to index
    %c0_215 = arith.constant 0 : index
    %455 = vector.load %arg4[%454, %c0_215] : memref<16x128xf32, #tpu.memory_space<vmem>>, vector<1x128xf32>
    %c32 = arith.constant 32 : index
    %c0_216 = arith.constant 0 : index
    %456 = vector.load %arg6[%c32, %c0_216] : memref<64x128xf32, #tpu.memory_space<vmem>>, vector<1x128xf32>
    tpu.vector_store %arg6[%c32, %c0_216], %455 {strides = array<i32>} : memref<64x128xf32, #tpu.memory_space<vmem>>, vector<1x128xf32>,
    %c8_i32_217 = arith.constant 8 : i32
    %457 = arith.muli %445, %c8_i32_217 : i32
    %c1_i32_218 = arith.constant 1 : i32
    %458 = arith.addi %457, %c1_i32_218 : i32
    %459 = arith.index_cast %458 : i32 to index
    %460 = memref.load %arg2[%459] : memref<64xi32, #tpu.memory_space<smem>>
    %461 = arith.index_cast %460 : i32 to index
    %c0_219 = arith.constant 0 : index
    %462 = vector.load %arg4[%461, %c0_219] : memref<16x128xf32, #tpu.memory_space<vmem>>, vector<1x128xf32>
    %c33 = arith.constant 33 : index
    %c0_220 = arith.constant 0 : index
    %463 = vector.load %arg6[%c33, %c0_220] : memref<64x128xf32, #tpu.memory_space<vmem>>, vector<1x128xf32>
    tpu.vector_store %arg6[%c33, %c0_220], %462 {strides = array<i32>} : memref<64x128xf32, #tpu.memory_space<vmem>>, vector<1x128xf32>,
    %c8_i32_221 = arith.constant 8 : i32
    %464 = arith.muli %445, %c8_i32_221 : i32
    %c2_i32_222 = arith.constant 2 : i32
    %465 = arith.addi %464, %c2_i32_222 : i32
    %466 = arith.index_cast %465 : i32 to index
    %467 = memref.load %arg2[%466] : memref<64xi32, #tpu.memory_space<smem>>
    %468 = arith.index_cast %467 : i32 to index
    %c0_223 = arith.constant 0 : index
    %469 = vector.load %arg4[%468, %c0_223] : memref<16x128xf32, #tpu.memory_space<vmem>>, vector<1x128xf32>
    %c34 = arith.constant 34 : index
    %c0_224 = arith.constant 0 : index
    %470 = vector.load %arg6[%c34, %c0_224] : memref<64x128xf32, #tpu.memory_space<vmem>>, vector<1x128xf32>
    tpu.vector_store %arg6[%c34, %c0_224], %469 {strides = array<i32>} : memref<64x128xf32, #tpu.memory_space<vmem>>, vector<1x128xf32>,
    %c8_i32_225 = arith.constant 8 : i32
    %471 = arith.muli %445, %c8_i32_225 : i32
    %c3_i32_226 = arith.constant 3 : i32
    %472 = arith.addi %471, %c3_i32_226 : i32
    %473 = arith.index_cast %472 : i32 to index
    %474 = memref.load %arg2[%473] : memref<64xi32, #tpu.memory_space<smem>>
    %475 = arith.index_cast %474 : i32 to index
    %c0_227 = arith.constant 0 : index
    %476 = vector.load %arg4[%475, %c0_227] : memref<16x128xf32, #tpu.memory_space<vmem>>, vector<1x128xf32>
    %c35 = arith.constant 35 : index
    %c0_228 = arith.constant 0 : index
    %477 = vector.load %arg6[%c35, %c0_228] : memref<64x128xf32, #tpu.memory_space<vmem>>, vector<1x128xf32>
    tpu.vector_store %arg6[%c35, %c0_228], %476 {strides = array<i32>} : memref<64x128xf32, #tpu.memory_space<vmem>>, vector<1x128xf32>,
    %c8_i32_229 = arith.constant 8 : i32
    %478 = arith.muli %445, %c8_i32_229 : i32
    %c4_i32_230 = arith.constant 4 : i32
    %479 = arith.addi %478, %c4_i32_230 : i32
    %480 = arith.index_cast %479 : i32 to index
    %481 = memref.load %arg2[%480] : memref<64xi32, #tpu.memory_space<smem>>
    %482 = arith.index_cast %481 : i32 to index
    %c0_231 = arith.constant 0 : index
    %483 = vector.load %arg4[%482, %c0_231] : memref<16x128xf32, #tpu.memory_space<vmem>>, vector<1x128xf32>
    %c36 = arith.constant 36 : index
    %c0_232 = arith.constant 0 : index
    %484 = vector.load %arg6[%c36, %c0_232] : memref<64x128xf32, #tpu.memory_space<vmem>>, vector<1x128xf32>
    tpu.vector_store %arg6[%c36, %c0_232], %483 {strides = array<i32>} : memref<64x128xf32, #tpu.memory_space<vmem>>, vector<1x128xf32>,
    %c8_i32_233 = arith.constant 8 : i32
    %485 = arith.muli %445, %c8_i32_233 : i32
    %c5_i32_234 = arith.constant 5 : i32
    %486 = arith.addi %485, %c5_i32_234 : i32
    %487 = arith.index_cast %486 : i32 to index
    %488 = memref.load %arg2[%487] : memref<64xi32, #tpu.memory_space<smem>>
    %489 = arith.index_cast %488 : i32 to index
    %c0_235 = arith.constant 0 : index
    %490 = vector.load %arg4[%489, %c0_235] : memref<16x128xf32, #tpu.memory_space<vmem>>, vector<1x128xf32>
    %c37 = arith.constant 37 : index
    %c0_236 = arith.constant 0 : index
    %491 = vector.load %arg6[%c37, %c0_236] : memref<64x128xf32, #tpu.memory_space<vmem>>, vector<1x128xf32>
    tpu.vector_store %arg6[%c37, %c0_236], %490 {strides = array<i32>} : memref<64x128xf32, #tpu.memory_space<vmem>>, vector<1x128xf32>,
    %c8_i32_237 = arith.constant 8 : i32
    %492 = arith.muli %445, %c8_i32_237 : i32
    %c6_i32_238 = arith.constant 6 : i32
    %493 = arith.addi %492, %c6_i32_238 : i32
    %494 = arith.index_cast %493 : i32 to index
    %495 = memref.load %arg2[%494] : memref<64xi32, #tpu.memory_space<smem>>
    %496 = arith.index_cast %495 : i32 to index
    %c0_239 = arith.constant 0 : index
    %497 = vector.load %arg4[%496, %c0_239] : memref<16x128xf32, #tpu.memory_space<vmem>>, vector<1x128xf32>
    %c38 = arith.constant 38 : index
    %c0_240 = arith.constant 0 : index
    %498 = vector.load %arg6[%c38, %c0_240] : memref<64x128xf32, #tpu.memory_space<vmem>>, vector<1x128xf32>
    tpu.vector_store %arg6[%c38, %c0_240], %497 {strides = array<i32>} : memref<64x128xf32, #tpu.memory_space<vmem>>, vector<1x128xf32>,
    %c8_i32_241 = arith.constant 8 : i32
    %499 = arith.muli %445, %c8_i32_241 : i32
    %c7_i32_242 = arith.constant 7 : i32
    %500 = arith.addi %499, %c7_i32_242 : i32
    %501 = arith.index_cast %500 : i32 to index
    %502 = memref.load %arg2[%501] : memref<64xi32, #tpu.memory_space<smem>>
    %503 = arith.index_cast %502 : i32 to index
    %c0_243 = arith.constant 0 : index
    %504 = vector.load %arg4[%503, %c0_243] : memref<16x128xf32, #tpu.memory_space<vmem>>, vector<1x128xf32>
    %c39 = arith.constant 39 : index
    %c0_244 = arith.constant 0 : index
    %505 = vector.load %arg6[%c39, %c0_244] : memref<64x128xf32, #tpu.memory_space<vmem>>, vector<1x128xf32>
    tpu.vector_store %arg6[%c39, %c0_244], %504 {strides = array<i32>} : memref<64x128xf32, #tpu.memory_space<vmem>>, vector<1x128xf32>,
    %c32_245 = arith.constant 32 : index
    %c0_246 = arith.constant 0 : index
    %506 = vector.load %arg6[%c32_245, %c0_246] : memref<64x128xf32, #tpu.memory_space<vmem>>, vector<8x128xf32>
    %507 = vector.broadcast %449 : vector<1x128xf32> to vector<8x128xf32>
    %508 = arith.mulf %506, %507 : vector<8x128xf32>
    %cst_247 = arith.constant dense<0.000000e+00> : vector<8xf32>
    %509 = vector.multi_reduction <add>, %508, %cst_247 [1] : vector<8x128xf32> to vector<8xf32>
    %510 = vector.shape_cast %509 : vector<8xf32> to vector<8x1xf32>
    %cst_248 = arith.constant -2.000000e+01 : f32
    %cst_249 = arith.constant 2.000000e+01 : f32
    %511 = vector.broadcast %cst_248 : f32 to vector<8x1xf32>
    %512 = arith.maximumf %511, %510 : vector<8x1xf32>
    %513 = vector.broadcast %cst_249 : f32 to vector<8x1xf32>
    %514 = arith.minimumf %513, %512 : vector<8x1xf32>
    %515 = tpu.iota {dimensions = array<i32: 0>} : vector<8x1xi32>
    %c0_i32_250 = arith.constant 0 : i32
    %516 = vector.broadcast %c0_i32_250 : i32 to vector<8x1xi32>
    %517 = arith.cmpi eq, %515, %516 : vector<8x1xi32>
    %cst_251 = arith.constant 0.000000e+00 : f32
    %518 = vector.broadcast %cst_251 : f32 to vector<8x1xf32>
    %519 = arith.subf %518, %514 : vector<8x1xf32>
    %cst_252 = arith.constant 0.000000e+00 : f32
    %520 = vector.broadcast %cst_252 : f32 to vector<8x1xf32>
    %521 = arith.maximumf %519, %520 : vector<8x1xf32>
    %522 = math.absf %519 : vector<8x1xf32>
    %cst_253 = arith.constant 0.000000e+00 : f32
    %523 = vector.broadcast %cst_253 : f32 to vector<8x1xf32>
    %524 = arith.subf %523, %522 : vector<8x1xf32>
    %525 = math.exp %524 : vector<8x1xf32>
    %cst_254 = arith.constant 1.000000e+00 : f32
    %526 = vector.broadcast %cst_254 : f32 to vector<8x1xf32>
    %527 = arith.addf %526, %525 : vector<8x1xf32>
    %528 = math.log %527 : vector<8x1xf32>
    %529 = arith.addf %521, %528 : vector<8x1xf32>
    %cst_255 = arith.constant 0.000000e+00 : f32
    %530 = vector.broadcast %cst_255 : f32 to vector<8x1xf32>
    %531 = arith.subf %530, %529 : vector<8x1xf32>
    %cst_256 = arith.constant 0.000000e+00 : f32
    %532 = vector.broadcast %cst_256 : f32 to vector<8x1xf32>
    %533 = arith.maximumf %514, %532 : vector<8x1xf32>
    %534 = math.absf %514 : vector<8x1xf32>
    %cst_257 = arith.constant 0.000000e+00 : f32
    %535 = vector.broadcast %cst_257 : f32 to vector<8x1xf32>
    %536 = arith.subf %535, %534 : vector<8x1xf32>
    %537 = math.exp %536 : vector<8x1xf32>
    %cst_258 = arith.constant 1.000000e+00 : f32
    %538 = vector.broadcast %cst_258 : f32 to vector<8x1xf32>
    %539 = arith.addf %538, %537 : vector<8x1xf32>
    %540 = math.log %539 : vector<8x1xf32>
    %541 = arith.addf %533, %540 : vector<8x1xf32>
    %cst_259 = arith.constant 0.000000e+00 : f32
    %542 = vector.broadcast %cst_259 : f32 to vector<8x1xf32>
    %543 = arith.subf %542, %541 : vector<8x1xf32>
    %544 = arith.select %517, %531, %543 : vector<8x1xi1>, vector<8x1xf32>
    %545 = vector.shape_cast %544 : vector<8x1xf32> to vector<1x8x1xf32>
    %cst_260 = arith.constant dense<0.000000e+00> : vector<1xf32>
    %546 = vector.multi_reduction <add>, %545, %cst_260 [1, 2] : vector<1x8x1xf32> to vector<1xf32>
    %547 = vector.shape_cast %546 : vector<1xf32> to vector<1x1x1xf32>
    %548 = vector.extract %547[0, 0, 0] : f32 from vector<1x1x1xf32>
    %549 = vector.broadcast %548 : f32 to vector<1x1xf32>
    %cst_261 = arith.constant 8.000000e+00 : f32
    %550 = vector.broadcast %cst_261 : f32 to vector<1x1xf32>
    %551 = arith.divf %549, %550 : vector<1x1xf32>
    %cst_262 = arith.constant 0.000000e+00 : f32
    %552 = vector.broadcast %cst_262 : f32 to vector<1x1xf32>
    %553 = arith.subf %552, %551 : vector<1x1xf32>
    %c4_263 = arith.constant 4 : index
    %c0_264 = arith.constant 0 : index
    %554 = vector.load %arg5[%c4_263, %c0_264] : memref<8x1xf32, #tpu.memory_space<vmem>>, vector<1x1xf32>
    tpu.vector_store %arg5[%c4_263, %c0_264], %553 {strides = array<i32>} : memref<8x1xf32, #tpu.memory_space<vmem>>, vector<1x1xf32>,
    %c8_i32_265 = arith.constant 8 : i32
    %555 = arith.muli %arg0, %c8_i32_265 : i32
    %c5_i32_266 = arith.constant 5 : i32
    %556 = arith.addi %555, %c5_i32_266 : i32
    %557 = arith.index_cast %556 : i32 to index
    %558 = memref.load %arg1[%557] : memref<8xi32, #tpu.memory_space<smem>>
    %559 = arith.index_cast %558 : i32 to index
    %c0_267 = arith.constant 0 : index
    %560 = vector.load %arg3[%559, %c0_267] : memref<16x128xf32, #tpu.memory_space<vmem>>, vector<1x128xf32>
    %c8_i32_268 = arith.constant 8 : i32
    %561 = arith.muli %556, %c8_i32_268 : i32
    %c0_i32_269 = arith.constant 0 : i32
    %562 = arith.addi %561, %c0_i32_269 : i32
    %563 = arith.index_cast %562 : i32 to index
    %564 = memref.load %arg2[%563] : memref<64xi32, #tpu.memory_space<smem>>
    %565 = arith.index_cast %564 : i32 to index
    %c0_270 = arith.constant 0 : index
    %566 = vector.load %arg4[%565, %c0_270] : memref<16x128xf32, #tpu.memory_space<vmem>>, vector<1x128xf32>
    %c40 = arith.constant 40 : index
    %c0_271 = arith.constant 0 : index
    %567 = vector.load %arg6[%c40, %c0_271] : memref<64x128xf32, #tpu.memory_space<vmem>>, vector<1x128xf32>
    tpu.vector_store %arg6[%c40, %c0_271], %566 {strides = array<i32>} : memref<64x128xf32, #tpu.memory_space<vmem>>, vector<1x128xf32>,
    %c8_i32_272 = arith.constant 8 : i32
    %568 = arith.muli %556, %c8_i32_272 : i32
    %c1_i32_273 = arith.constant 1 : i32
    %569 = arith.addi %568, %c1_i32_273 : i32
    %570 = arith.index_cast %569 : i32 to index
    %571 = memref.load %arg2[%570] : memref<64xi32, #tpu.memory_space<smem>>
    %572 = arith.index_cast %571 : i32 to index
    %c0_274 = arith.constant 0 : index
    %573 = vector.load %arg4[%572, %c0_274] : memref<16x128xf32, #tpu.memory_space<vmem>>, vector<1x128xf32>
    %c41 = arith.constant 41 : index
    %c0_275 = arith.constant 0 : index
    %574 = vector.load %arg6[%c41, %c0_275] : memref<64x128xf32, #tpu.memory_space<vmem>>, vector<1x128xf32>
    tpu.vector_store %arg6[%c41, %c0_275], %573 {strides = array<i32>} : memref<64x128xf32, #tpu.memory_space<vmem>>, vector<1x128xf32>,
    %c8_i32_276 = arith.constant 8 : i32
    %575 = arith.muli %556, %c8_i32_276 : i32
    %c2_i32_277 = arith.constant 2 : i32
    %576 = arith.addi %575, %c2_i32_277 : i32
    %577 = arith.index_cast %576 : i32 to index
    %578 = memref.load %arg2[%577] : memref<64xi32, #tpu.memory_space<smem>>
    %579 = arith.index_cast %578 : i32 to index
    %c0_278 = arith.constant 0 : index
    %580 = vector.load %arg4[%579, %c0_278] : memref<16x128xf32, #tpu.memory_space<vmem>>, vector<1x128xf32>
    %c42 = arith.constant 42 : index
    %c0_279 = arith.constant 0 : index
    %581 = vector.load %arg6[%c42, %c0_279] : memref<64x128xf32, #tpu.memory_space<vmem>>, vector<1x128xf32>
    tpu.vector_store %arg6[%c42, %c0_279], %580 {strides = array<i32>} : memref<64x128xf32, #tpu.memory_space<vmem>>, vector<1x128xf32>,
    %c8_i32_280 = arith.constant 8 : i32
    %582 = arith.muli %556, %c8_i32_280 : i32
    %c3_i32_281 = arith.constant 3 : i32
    %583 = arith.addi %582, %c3_i32_281 : i32
    %584 = arith.index_cast %583 : i32 to index
    %585 = memref.load %arg2[%584] : memref<64xi32, #tpu.memory_space<smem>>
    %586 = arith.index_cast %585 : i32 to index
    %c0_282 = arith.constant 0 : index
    %587 = vector.load %arg4[%586, %c0_282] : memref<16x128xf32, #tpu.memory_space<vmem>>, vector<1x128xf32>
    %c43 = arith.constant 43 : index
    %c0_283 = arith.constant 0 : index
    %588 = vector.load %arg6[%c43, %c0_283] : memref<64x128xf32, #tpu.memory_space<vmem>>, vector<1x128xf32>
    tpu.vector_store %arg6[%c43, %c0_283], %587 {strides = array<i32>} : memref<64x128xf32, #tpu.memory_space<vmem>>, vector<1x128xf32>,
    %c8_i32_284 = arith.constant 8 : i32
    %589 = arith.muli %556, %c8_i32_284 : i32
    %c4_i32_285 = arith.constant 4 : i32
    %590 = arith.addi %589, %c4_i32_285 : i32
    %591 = arith.index_cast %590 : i32 to index
    %592 = memref.load %arg2[%591] : memref<64xi32, #tpu.memory_space<smem>>
    %593 = arith.index_cast %592 : i32 to index
    %c0_286 = arith.constant 0 : index
    %594 = vector.load %arg4[%593, %c0_286] : memref<16x128xf32, #tpu.memory_space<vmem>>, vector<1x128xf32>
    %c44 = arith.constant 44 : index
    %c0_287 = arith.constant 0 : index
    %595 = vector.load %arg6[%c44, %c0_287] : memref<64x128xf32, #tpu.memory_space<vmem>>, vector<1x128xf32>
    tpu.vector_store %arg6[%c44, %c0_287], %594 {strides = array<i32>} : memref<64x128xf32, #tpu.memory_space<vmem>>, vector<1x128xf32>,
    %c8_i32_288 = arith.constant 8 : i32
    %596 = arith.muli %556, %c8_i32_288 : i32
    %c5_i32_289 = arith.constant 5 : i32
    %597 = arith.addi %596, %c5_i32_289 : i32
    %598 = arith.index_cast %597 : i32 to index
    %599 = memref.load %arg2[%598] : memref<64xi32, #tpu.memory_space<smem>>
    %600 = arith.index_cast %599 : i32 to index
    %c0_290 = arith.constant 0 : index
    %601 = vector.load %arg4[%600, %c0_290] : memref<16x128xf32, #tpu.memory_space<vmem>>, vector<1x128xf32>
    %c45 = arith.constant 45 : index
    %c0_291 = arith.constant 0 : index
    %602 = vector.load %arg6[%c45, %c0_291] : memref<64x128xf32, #tpu.memory_space<vmem>>, vector<1x128xf32>
    tpu.vector_store %arg6[%c45, %c0_291], %601 {strides = array<i32>} : memref<64x128xf32, #tpu.memory_space<vmem>>, vector<1x128xf32>,
    %c8_i32_292 = arith.constant 8 : i32
    %603 = arith.muli %556, %c8_i32_292 : i32
    %c6_i32_293 = arith.constant 6 : i32
    %604 = arith.addi %603, %c6_i32_293 : i32
    %605 = arith.index_cast %604 : i32 to index
    %606 = memref.load %arg2[%605] : memref<64xi32, #tpu.memory_space<smem>>
    %607 = arith.index_cast %606 : i32 to index
    %c0_294 = arith.constant 0 : index
    %608 = vector.load %arg4[%607, %c0_294] : memref<16x128xf32, #tpu.memory_space<vmem>>, vector<1x128xf32>
    %c46 = arith.constant 46 : index
    %c0_295 = arith.constant 0 : index
    %609 = vector.load %arg6[%c46, %c0_295] : memref<64x128xf32, #tpu.memory_space<vmem>>, vector<1x128xf32>
    tpu.vector_store %arg6[%c46, %c0_295], %608 {strides = array<i32>} : memref<64x128xf32, #tpu.memory_space<vmem>>, vector<1x128xf32>,
    %c8_i32_296 = arith.constant 8 : i32
    %610 = arith.muli %556, %c8_i32_296 : i32
    %c7_i32_297 = arith.constant 7 : i32
    %611 = arith.addi %610, %c7_i32_297 : i32
    %612 = arith.index_cast %611 : i32 to index
    %613 = memref.load %arg2[%612] : memref<64xi32, #tpu.memory_space<smem>>
    %614 = arith.index_cast %613 : i32 to index
    %c0_298 = arith.constant 0 : index
    %615 = vector.load %arg4[%614, %c0_298] : memref<16x128xf32, #tpu.memory_space<vmem>>, vector<1x128xf32>
    %c47 = arith.constant 47 : index
    %c0_299 = arith.constant 0 : index
    %616 = vector.load %arg6[%c47, %c0_299] : memref<64x128xf32, #tpu.memory_space<vmem>>, vector<1x128xf32>
    tpu.vector_store %arg6[%c47, %c0_299], %615 {strides = array<i32>} : memref<64x128xf32, #tpu.memory_space<vmem>>, vector<1x128xf32>,
    %c40_300 = arith.constant 40 : index
    %c0_301 = arith.constant 0 : index
    %617 = vector.load %arg6[%c40_300, %c0_301] : memref<64x128xf32, #tpu.memory_space<vmem>>, vector<8x128xf32>
    %618 = vector.broadcast %560 : vector<1x128xf32> to vector<8x128xf32>
    %619 = arith.mulf %617, %618 : vector<8x128xf32>
    %cst_302 = arith.constant dense<0.000000e+00> : vector<8xf32>
    %620 = vector.multi_reduction <add>, %619, %cst_302 [1] : vector<8x128xf32> to vector<8xf32>
    %621 = vector.shape_cast %620 : vector<8xf32> to vector<8x1xf32>
    %cst_303 = arith.constant -2.000000e+01 : f32
    %cst_304 = arith.constant 2.000000e+01 : f32
    %622 = vector.broadcast %cst_303 : f32 to vector<8x1xf32>
    %623 = arith.maximumf %622, %621 : vector<8x1xf32>
    %624 = vector.broadcast %cst_304 : f32 to vector<8x1xf32>
    %625 = arith.minimumf %624, %623 : vector<8x1xf32>
    %626 = tpu.iota {dimensions = array<i32: 0>} : vector<8x1xi32>
    %c0_i32_305 = arith.constant 0 : i32
    %627 = vector.broadcast %c0_i32_305 : i32 to vector<8x1xi32>
    %628 = arith.cmpi eq, %626, %627 : vector<8x1xi32>
    %cst_306 = arith.constant 0.000000e+00 : f32
    %629 = vector.broadcast %cst_306 : f32 to vector<8x1xf32>
    %630 = arith.subf %629, %625 : vector<8x1xf32>
    %cst_307 = arith.constant 0.000000e+00 : f32
    %631 = vector.broadcast %cst_307 : f32 to vector<8x1xf32>
    %632 = arith.maximumf %630, %631 : vector<8x1xf32>
    %633 = math.absf %630 : vector<8x1xf32>
    %cst_308 = arith.constant 0.000000e+00 : f32
    %634 = vector.broadcast %cst_308 : f32 to vector<8x1xf32>
    %635 = arith.subf %634, %633 : vector<8x1xf32>
    %636 = math.exp %635 : vector<8x1xf32>
    %cst_309 = arith.constant 1.000000e+00 : f32
    %637 = vector.broadcast %cst_309 : f32 to vector<8x1xf32>
    %638 = arith.addf %637, %636 : vector<8x1xf32>
    %639 = math.log %638 : vector<8x1xf32>
    %640 = arith.addf %632, %639 : vector<8x1xf32>
    %cst_310 = arith.constant 0.000000e+00 : f32
    %641 = vector.broadcast %cst_310 : f32 to vector<8x1xf32>
    %642 = arith.subf %641, %640 : vector<8x1xf32>
    %cst_311 = arith.constant 0.000000e+00 : f32
    %643 = vector.broadcast %cst_311 : f32 to vector<8x1xf32>
    %644 = arith.maximumf %625, %643 : vector<8x1xf32>
    %645 = math.absf %625 : vector<8x1xf32>
    %cst_312 = arith.constant 0.000000e+00 : f32
    %646 = vector.broadcast %cst_312 : f32 to vector<8x1xf32>
    %647 = arith.subf %646, %645 : vector<8x1xf32>
    %648 = math.exp %647 : vector<8x1xf32>
    %cst_313 = arith.constant 1.000000e+00 : f32
    %649 = vector.broadcast %cst_313 : f32 to vector<8x1xf32>
    %650 = arith.addf %649, %648 : vector<8x1xf32>
    %651 = math.log %650 : vector<8x1xf32>
    %652 = arith.addf %644, %651 : vector<8x1xf32>
    %cst_314 = arith.constant 0.000000e+00 : f32
    %653 = vector.broadcast %cst_314 : f32 to vector<8x1xf32>
    %654 = arith.subf %653, %652 : vector<8x1xf32>
    %655 = arith.select %628, %642, %654 : vector<8x1xi1>, vector<8x1xf32>
    %656 = vector.shape_cast %655 : vector<8x1xf32> to vector<1x8x1xf32>
    %cst_315 = arith.constant dense<0.000000e+00> : vector<1xf32>
    %657 = vector.multi_reduction <add>, %656, %cst_315 [1, 2] : vector<1x8x1xf32> to vector<1xf32>
    %658 = vector.shape_cast %657 : vector<1xf32> to vector<1x1x1xf32>
    %659 = vector.extract %658[0, 0, 0] : f32 from vector<1x1x1xf32>
    %660 = vector.broadcast %659 : f32 to vector<1x1xf32>
    %cst_316 = arith.constant 8.000000e+00 : f32
    %661 = vector.broadcast %cst_316 : f32 to vector<1x1xf32>
    %662 = arith.divf %660, %661 : vector<1x1xf32>
    %cst_317 = arith.constant 0.000000e+00 : f32
    %663 = vector.broadcast %cst_317 : f32 to vector<1x1xf32>
    %664 = arith.subf %663, %662 : vector<1x1xf32>
    %c5_318 = arith.constant 5 : index
    %c0_319 = arith.constant 0 : index
    %665 = vector.load %arg5[%c5_318, %c0_319] : memref<8x1xf32, #tpu.memory_space<vmem>>, vector<1x1xf32>
    tpu.vector_store %arg5[%c5_318, %c0_319], %664 {strides = array<i32>} : memref<8x1xf32, #tpu.memory_space<vmem>>, vector<1x1xf32>,
    %c8_i32_320 = arith.constant 8 : i32
    %666 = arith.muli %arg0, %c8_i32_320 : i32
    %c6_i32_321 = arith.constant 6 : i32
    %667 = arith.addi %666, %c6_i32_321 : i32
    %668 = arith.index_cast %667 : i32 to index
    %669 = memref.load %arg1[%668] : memref<8xi32, #tpu.memory_space<smem>>
    %670 = arith.index_cast %669 : i32 to index
    %c0_322 = arith.constant 0 : index
    %671 = vector.load %arg3[%670, %c0_322] : memref<16x128xf32, #tpu.memory_space<vmem>>, vector<1x128xf32>
    %c8_i32_323 = arith.constant 8 : i32
    %672 = arith.muli %667, %c8_i32_323 : i32
    %c0_i32_324 = arith.constant 0 : i32
    %673 = arith.addi %672, %c0_i32_324 : i32
    %674 = arith.index_cast %673 : i32 to index
    %675 = memref.load %arg2[%674] : memref<64xi32, #tpu.memory_space<smem>>
    %676 = arith.index_cast %675 : i32 to index
    %c0_325 = arith.constant 0 : index
    %677 = vector.load %arg4[%676, %c0_325] : memref<16x128xf32, #tpu.memory_space<vmem>>, vector<1x128xf32>
    %c48 = arith.constant 48 : index
    %c0_326 = arith.constant 0 : index
    %678 = vector.load %arg6[%c48, %c0_326] : memref<64x128xf32, #tpu.memory_space<vmem>>, vector<1x128xf32>
    tpu.vector_store %arg6[%c48, %c0_326], %677 {strides = array<i32>} : memref<64x128xf32, #tpu.memory_space<vmem>>, vector<1x128xf32>,
    %c8_i32_327 = arith.constant 8 : i32
    %679 = arith.muli %667, %c8_i32_327 : i32
    %c1_i32_328 = arith.constant 1 : i32
    %680 = arith.addi %679, %c1_i32_328 : i32
    %681 = arith.index_cast %680 : i32 to index
    %682 = memref.load %arg2[%681] : memref<64xi32, #tpu.memory_space<smem>>
    %683 = arith.index_cast %682 : i32 to index
    %c0_329 = arith.constant 0 : index
    %684 = vector.load %arg4[%683, %c0_329] : memref<16x128xf32, #tpu.memory_space<vmem>>, vector<1x128xf32>
    %c49 = arith.constant 49 : index
    %c0_330 = arith.constant 0 : index
    %685 = vector.load %arg6[%c49, %c0_330] : memref<64x128xf32, #tpu.memory_space<vmem>>, vector<1x128xf32>
    tpu.vector_store %arg6[%c49, %c0_330], %684 {strides = array<i32>} : memref<64x128xf32, #tpu.memory_space<vmem>>, vector<1x128xf32>,
    %c8_i32_331 = arith.constant 8 : i32
    %686 = arith.muli %667, %c8_i32_331 : i32
    %c2_i32_332 = arith.constant 2 : i32
    %687 = arith.addi %686, %c2_i32_332 : i32
    %688 = arith.index_cast %687 : i32 to index
    %689 = memref.load %arg2[%688] : memref<64xi32, #tpu.memory_space<smem>>
    %690 = arith.index_cast %689 : i32 to index
    %c0_333 = arith.constant 0 : index
    %691 = vector.load %arg4[%690, %c0_333] : memref<16x128xf32, #tpu.memory_space<vmem>>, vector<1x128xf32>
    %c50 = arith.constant 50 : index
    %c0_334 = arith.constant 0 : index
    %692 = vector.load %arg6[%c50, %c0_334] : memref<64x128xf32, #tpu.memory_space<vmem>>, vector<1x128xf32>
    tpu.vector_store %arg6[%c50, %c0_334], %691 {strides = array<i32>} : memref<64x128xf32, #tpu.memory_space<vmem>>, vector<1x128xf32>,
    %c8_i32_335 = arith.constant 8 : i32
    %693 = arith.muli %667, %c8_i32_335 : i32
    %c3_i32_336 = arith.constant 3 : i32
    %694 = arith.addi %693, %c3_i32_336 : i32
    %695 = arith.index_cast %694 : i32 to index
    %696 = memref.load %arg2[%695] : memref<64xi32, #tpu.memory_space<smem>>
    %697 = arith.index_cast %696 : i32 to index
    %c0_337 = arith.constant 0 : index
    %698 = vector.load %arg4[%697, %c0_337] : memref<16x128xf32, #tpu.memory_space<vmem>>, vector<1x128xf32>
    %c51 = arith.constant 51 : index
    %c0_338 = arith.constant 0 : index
    %699 = vector.load %arg6[%c51, %c0_338] : memref<64x128xf32, #tpu.memory_space<vmem>>, vector<1x128xf32>
    tpu.vector_store %arg6[%c51, %c0_338], %698 {strides = array<i32>} : memref<64x128xf32, #tpu.memory_space<vmem>>, vector<1x128xf32>,
    %c8_i32_339 = arith.constant 8 : i32
    %700 = arith.muli %667, %c8_i32_339 : i32
    %c4_i32_340 = arith.constant 4 : i32
    %701 = arith.addi %700, %c4_i32_340 : i32
    %702 = arith.index_cast %701 : i32 to index
    %703 = memref.load %arg2[%702] : memref<64xi32, #tpu.memory_space<smem>>
    %704 = arith.index_cast %703 : i32 to index
    %c0_341 = arith.constant 0 : index
    %705 = vector.load %arg4[%704, %c0_341] : memref<16x128xf32, #tpu.memory_space<vmem>>, vector<1x128xf32>
    %c52 = arith.constant 52 : index
    %c0_342 = arith.constant 0 : index
    %706 = vector.load %arg6[%c52, %c0_342] : memref<64x128xf32, #tpu.memory_space<vmem>>, vector<1x128xf32>
    tpu.vector_store %arg6[%c52, %c0_342], %705 {strides = array<i32>} : memref<64x128xf32, #tpu.memory_space<vmem>>, vector<1x128xf32>,
    %c8_i32_343 = arith.constant 8 : i32
    %707 = arith.muli %667, %c8_i32_343 : i32
    %c5_i32_344 = arith.constant 5 : i32
    %708 = arith.addi %707, %c5_i32_344 : i32
    %709 = arith.index_cast %708 : i32 to index
    %710 = memref.load %arg2[%709] : memref<64xi32, #tpu.memory_space<smem>>
    %711 = arith.index_cast %710 : i32 to index
    %c0_345 = arith.constant 0 : index
    %712 = vector.load %arg4[%711, %c0_345] : memref<16x128xf32, #tpu.memory_space<vmem>>, vector<1x128xf32>
    %c53 = arith.constant 53 : index
    %c0_346 = arith.constant 0 : index
    %713 = vector.load %arg6[%c53, %c0_346] : memref<64x128xf32, #tpu.memory_space<vmem>>, vector<1x128xf32>
    tpu.vector_store %arg6[%c53, %c0_346], %712 {strides = array<i32>} : memref<64x128xf32, #tpu.memory_space<vmem>>, vector<1x128xf32>,
    %c8_i32_347 = arith.constant 8 : i32
    %714 = arith.muli %667, %c8_i32_347 : i32
    %c6_i32_348 = arith.constant 6 : i32
    %715 = arith.addi %714, %c6_i32_348 : i32
    %716 = arith.index_cast %715 : i32 to index
    %717 = memref.load %arg2[%716] : memref<64xi32, #tpu.memory_space<smem>>
    %718 = arith.index_cast %717 : i32 to index
    %c0_349 = arith.constant 0 : index
    %719 = vector.load %arg4[%718, %c0_349] : memref<16x128xf32, #tpu.memory_space<vmem>>, vector<1x128xf32>
    %c54 = arith.constant 54 : index
    %c0_350 = arith.constant 0 : index
    %720 = vector.load %arg6[%c54, %c0_350] : memref<64x128xf32, #tpu.memory_space<vmem>>, vector<1x128xf32>
    tpu.vector_store %arg6[%c54, %c0_350], %719 {strides = array<i32>} : memref<64x128xf32, #tpu.memory_space<vmem>>, vector<1x128xf32>,
    %c8_i32_351 = arith.constant 8 : i32
    %721 = arith.muli %667, %c8_i32_351 : i32
    %c7_i32_352 = arith.constant 7 : i32
    %722 = arith.addi %721, %c7_i32_352 : i32
    %723 = arith.index_cast %722 : i32 to index
    %724 = memref.load %arg2[%723] : memref<64xi32, #tpu.memory_space<smem>>
    %725 = arith.index_cast %724 : i32 to index
    %c0_353 = arith.constant 0 : index
    %726 = vector.load %arg4[%725, %c0_353] : memref<16x128xf32, #tpu.memory_space<vmem>>, vector<1x128xf32>
    %c55 = arith.constant 55 : index
    %c0_354 = arith.constant 0 : index
    %727 = vector.load %arg6[%c55, %c0_354] : memref<64x128xf32, #tpu.memory_space<vmem>>, vector<1x128xf32>
    tpu.vector_store %arg6[%c55, %c0_354], %726 {strides = array<i32>} : memref<64x128xf32, #tpu.memory_space<vmem>>, vector<1x128xf32>,
    %c48_355 = arith.constant 48 : index
    %c0_356 = arith.constant 0 : index
    %728 = vector.load %arg6[%c48_355, %c0_356] : memref<64x128xf32, #tpu.memory_space<vmem>>, vector<8x128xf32>
    %729 = vector.broadcast %671 : vector<1x128xf32> to vector<8x128xf32>
    %730 = arith.mulf %728, %729 : vector<8x128xf32>
    %cst_357 = arith.constant dense<0.000000e+00> : vector<8xf32>
    %731 = vector.multi_reduction <add>, %730, %cst_357 [1] : vector<8x128xf32> to vector<8xf32>
    %732 = vector.shape_cast %731 : vector<8xf32> to vector<8x1xf32>
    %cst_358 = arith.constant -2.000000e+01 : f32
    %cst_359 = arith.constant 2.000000e+01 : f32
    %733 = vector.broadcast %cst_358 : f32 to vector<8x1xf32>
    %734 = arith.maximumf %733, %732 : vector<8x1xf32>
    %735 = vector.broadcast %cst_359 : f32 to vector<8x1xf32>
    %736 = arith.minimumf %735, %734 : vector<8x1xf32>
    %737 = tpu.iota {dimensions = array<i32: 0>} : vector<8x1xi32>
    %c0_i32_360 = arith.constant 0 : i32
    %738 = vector.broadcast %c0_i32_360 : i32 to vector<8x1xi32>
    %739 = arith.cmpi eq, %737, %738 : vector<8x1xi32>
    %cst_361 = arith.constant 0.000000e+00 : f32
    %740 = vector.broadcast %cst_361 : f32 to vector<8x1xf32>
    %741 = arith.subf %740, %736 : vector<8x1xf32>
    %cst_362 = arith.constant 0.000000e+00 : f32
    %742 = vector.broadcast %cst_362 : f32 to vector<8x1xf32>
    %743 = arith.maximumf %741, %742 : vector<8x1xf32>
    %744 = math.absf %741 : vector<8x1xf32>
    %cst_363 = arith.constant 0.000000e+00 : f32
    %745 = vector.broadcast %cst_363 : f32 to vector<8x1xf32>
    %746 = arith.subf %745, %744 : vector<8x1xf32>
    %747 = math.exp %746 : vector<8x1xf32>
    %cst_364 = arith.constant 1.000000e+00 : f32
    %748 = vector.broadcast %cst_364 : f32 to vector<8x1xf32>
    %749 = arith.addf %748, %747 : vector<8x1xf32>
    %750 = math.log %749 : vector<8x1xf32>
    %751 = arith.addf %743, %750 : vector<8x1xf32>
    %cst_365 = arith.constant 0.000000e+00 : f32
    %752 = vector.broadcast %cst_365 : f32 to vector<8x1xf32>
    %753 = arith.subf %752, %751 : vector<8x1xf32>
    %cst_366 = arith.constant 0.000000e+00 : f32
    %754 = vector.broadcast %cst_366 : f32 to vector<8x1xf32>
    %755 = arith.maximumf %736, %754 : vector<8x1xf32>
    %756 = math.absf %736 : vector<8x1xf32>
    %cst_367 = arith.constant 0.000000e+00 : f32
    %757 = vector.broadcast %cst_367 : f32 to vector<8x1xf32>
    %758 = arith.subf %757, %756 : vector<8x1xf32>
    %759 = math.exp %758 : vector<8x1xf32>
    %cst_368 = arith.constant 1.000000e+00 : f32
    %760 = vector.broadcast %cst_368 : f32 to vector<8x1xf32>
    %761 = arith.addf %760, %759 : vector<8x1xf32>
    %762 = math.log %761 : vector<8x1xf32>
    %763 = arith.addf %755, %762 : vector<8x1xf32>
    %cst_369 = arith.constant 0.000000e+00 : f32
    %764 = vector.broadcast %cst_369 : f32 to vector<8x1xf32>
    %765 = arith.subf %764, %763 : vector<8x1xf32>
    %766 = arith.select %739, %753, %765 : vector<8x1xi1>, vector<8x1xf32>
    %767 = vector.shape_cast %766 : vector<8x1xf32> to vector<1x8x1xf32>
    %cst_370 = arith.constant dense<0.000000e+00> : vector<1xf32>
    %768 = vector.multi_reduction <add>, %767, %cst_370 [1, 2] : vector<1x8x1xf32> to vector<1xf32>
    %769 = vector.shape_cast %768 : vector<1xf32> to vector<1x1x1xf32>
    %770 = vector.extract %769[0, 0, 0] : f32 from vector<1x1x1xf32>
    %771 = vector.broadcast %770 : f32 to vector<1x1xf32>
    %cst_371 = arith.constant 8.000000e+00 : f32
    %772 = vector.broadcast %cst_371 : f32 to vector<1x1xf32>
    %773 = arith.divf %771, %772 : vector<1x1xf32>
    %cst_372 = arith.constant 0.000000e+00 : f32
    %774 = vector.broadcast %cst_372 : f32 to vector<1x1xf32>
    %775 = arith.subf %774, %773 : vector<1x1xf32>
    %c6_373 = arith.constant 6 : index
    %c0_374 = arith.constant 0 : index
    %776 = vector.load %arg5[%c6_373, %c0_374] : memref<8x1xf32, #tpu.memory_space<vmem>>, vector<1x1xf32>
    tpu.vector_store %arg5[%c6_373, %c0_374], %775 {strides = array<i32>} : memref<8x1xf32, #tpu.memory_space<vmem>>, vector<1x1xf32>,
    %c8_i32_375 = arith.constant 8 : i32
    %777 = arith.muli %arg0, %c8_i32_375 : i32
    %c7_i32_376 = arith.constant 7 : i32
    %778 = arith.addi %777, %c7_i32_376 : i32
    %779 = arith.index_cast %778 : i32 to index
    %780 = memref.load %arg1[%779] : memref<8xi32, #tpu.memory_space<smem>>
    %781 = arith.index_cast %780 : i32 to index
    %c0_377 = arith.constant 0 : index
    %782 = vector.load %arg3[%781, %c0_377] : memref<16x128xf32, #tpu.memory_space<vmem>>, vector<1x128xf32>
    %c8_i32_378 = arith.constant 8 : i32
    %783 = arith.muli %778, %c8_i32_378 : i32
    %c0_i32_379 = arith.constant 0 : i32
    %784 = arith.addi %783, %c0_i32_379 : i32
    %785 = arith.index_cast %784 : i32 to index
    %786 = memref.load %arg2[%785] : memref<64xi32, #tpu.memory_space<smem>>
    %787 = arith.index_cast %786 : i32 to index
    %c0_380 = arith.constant 0 : index
    %788 = vector.load %arg4[%787, %c0_380] : memref<16x128xf32, #tpu.memory_space<vmem>>, vector<1x128xf32>
    %c56 = arith.constant 56 : index
    %c0_381 = arith.constant 0 : index
    %789 = vector.load %arg6[%c56, %c0_381] : memref<64x128xf32, #tpu.memory_space<vmem>>, vector<1x128xf32>
    tpu.vector_store %arg6[%c56, %c0_381], %788 {strides = array<i32>} : memref<64x128xf32, #tpu.memory_space<vmem>>, vector<1x128xf32>,
    %c8_i32_382 = arith.constant 8 : i32
    %790 = arith.muli %778, %c8_i32_382 : i32
    %c1_i32_383 = arith.constant 1 : i32
    %791 = arith.addi %790, %c1_i32_383 : i32
    %792 = arith.index_cast %791 : i32 to index
    %793 = memref.load %arg2[%792] : memref<64xi32, #tpu.memory_space<smem>>
    %794 = arith.index_cast %793 : i32 to index
    %c0_384 = arith.constant 0 : index
    %795 = vector.load %arg4[%794, %c0_384] : memref<16x128xf32, #tpu.memory_space<vmem>>, vector<1x128xf32>
    %c57 = arith.constant 57 : index
    %c0_385 = arith.constant 0 : index
    %796 = vector.load %arg6[%c57, %c0_385] : memref<64x128xf32, #tpu.memory_space<vmem>>, vector<1x128xf32>
    tpu.vector_store %arg6[%c57, %c0_385], %795 {strides = array<i32>} : memref<64x128xf32, #tpu.memory_space<vmem>>, vector<1x128xf32>,
    %c8_i32_386 = arith.constant 8 : i32
    %797 = arith.muli %778, %c8_i32_386 : i32
    %c2_i32_387 = arith.constant 2 : i32
    %798 = arith.addi %797, %c2_i32_387 : i32
    %799 = arith.index_cast %798 : i32 to index
    %800 = memref.load %arg2[%799] : memref<64xi32, #tpu.memory_space<smem>>
    %801 = arith.index_cast %800 : i32 to index
    %c0_388 = arith.constant 0 : index
    %802 = vector.load %arg4[%801, %c0_388] : memref<16x128xf32, #tpu.memory_space<vmem>>, vector<1x128xf32>
    %c58 = arith.constant 58 : index
    %c0_389 = arith.constant 0 : index
    %803 = vector.load %arg6[%c58, %c0_389] : memref<64x128xf32, #tpu.memory_space<vmem>>, vector<1x128xf32>
    tpu.vector_store %arg6[%c58, %c0_389], %802 {strides = array<i32>} : memref<64x128xf32, #tpu.memory_space<vmem>>, vector<1x128xf32>,
    %c8_i32_390 = arith.constant 8 : i32
    %804 = arith.muli %778, %c8_i32_390 : i32
    %c3_i32_391 = arith.constant 3 : i32
    %805 = arith.addi %804, %c3_i32_391 : i32
    %806 = arith.index_cast %805 : i32 to index
    %807 = memref.load %arg2[%806] : memref<64xi32, #tpu.memory_space<smem>>
    %808 = arith.index_cast %807 : i32 to index
    %c0_392 = arith.constant 0 : index
    %809 = vector.load %arg4[%808, %c0_392] : memref<16x128xf32, #tpu.memory_space<vmem>>, vector<1x128xf32>
    %c59 = arith.constant 59 : index
    %c0_393 = arith.constant 0 : index
    %810 = vector.load %arg6[%c59, %c0_393] : memref<64x128xf32, #tpu.memory_space<vmem>>, vector<1x128xf32>
    tpu.vector_store %arg6[%c59, %c0_393], %809 {strides = array<i32>} : memref<64x128xf32, #tpu.memory_space<vmem>>, vector<1x128xf32>,
    %c8_i32_394 = arith.constant 8 : i32
    %811 = arith.muli %778, %c8_i32_394 : i32
    %c4_i32_395 = arith.constant 4 : i32
    %812 = arith.addi %811, %c4_i32_395 : i32
    %813 = arith.index_cast %812 : i32 to index
    %814 = memref.load %arg2[%813] : memref<64xi32, #tpu.memory_space<smem>>
    %815 = arith.index_cast %814 : i32 to index
    %c0_396 = arith.constant 0 : index
    %816 = vector.load %arg4[%815, %c0_396] : memref<16x128xf32, #tpu.memory_space<vmem>>, vector<1x128xf32>
    %c60 = arith.constant 60 : index
    %c0_397 = arith.constant 0 : index
    %817 = vector.load %arg6[%c60, %c0_397] : memref<64x128xf32, #tpu.memory_space<vmem>>, vector<1x128xf32>
    tpu.vector_store %arg6[%c60, %c0_397], %816 {strides = array<i32>} : memref<64x128xf32, #tpu.memory_space<vmem>>, vector<1x128xf32>,
    %c8_i32_398 = arith.constant 8 : i32
    %818 = arith.muli %778, %c8_i32_398 : i32
    %c5_i32_399 = arith.constant 5 : i32
    %819 = arith.addi %818, %c5_i32_399 : i32
    %820 = arith.index_cast %819 : i32 to index
    %821 = memref.load %arg2[%820] : memref<64xi32, #tpu.memory_space<smem>>
    %822 = arith.index_cast %821 : i32 to index
    %c0_400 = arith.constant 0 : index
    %823 = vector.load %arg4[%822, %c0_400] : memref<16x128xf32, #tpu.memory_space<vmem>>, vector<1x128xf32>
    %c61 = arith.constant 61 : index
    %c0_401 = arith.constant 0 : index
    %824 = vector.load %arg6[%c61, %c0_401] : memref<64x128xf32, #tpu.memory_space<vmem>>, vector<1x128xf32>
    tpu.vector_store %arg6[%c61, %c0_401], %823 {strides = array<i32>} : memref<64x128xf32, #tpu.memory_space<vmem>>, vector<1x128xf32>,
    %c8_i32_402 = arith.constant 8 : i32
    %825 = arith.muli %778, %c8_i32_402 : i32
    %c6_i32_403 = arith.constant 6 : i32
    %826 = arith.addi %825, %c6_i32_403 : i32
    %827 = arith.index_cast %826 : i32 to index
    %828 = memref.load %arg2[%827] : memref<64xi32, #tpu.memory_space<smem>>
    %829 = arith.index_cast %828 : i32 to index
    %c0_404 = arith.constant 0 : index
    %830 = vector.load %arg4[%829, %c0_404] : memref<16x128xf32, #tpu.memory_space<vmem>>, vector<1x128xf32>
    %c62 = arith.constant 62 : index
    %c0_405 = arith.constant 0 : index
    %831 = vector.load %arg6[%c62, %c0_405] : memref<64x128xf32, #tpu.memory_space<vmem>>, vector<1x128xf32>
    tpu.vector_store %arg6[%c62, %c0_405], %830 {strides = array<i32>} : memref<64x128xf32, #tpu.memory_space<vmem>>, vector<1x128xf32>,
    %c8_i32_406 = arith.constant 8 : i32
    %832 = arith.muli %778, %c8_i32_406 : i32
    %c7_i32_407 = arith.constant 7 : i32
    %833 = arith.addi %832, %c7_i32_407 : i32
    %834 = arith.index_cast %833 : i32 to index
    %835 = memref.load %arg2[%834] : memref<64xi32, #tpu.memory_space<smem>>
    %836 = arith.index_cast %835 : i32 to index
    %c0_408 = arith.constant 0 : index
    %837 = vector.load %arg4[%836, %c0_408] : memref<16x128xf32, #tpu.memory_space<vmem>>, vector<1x128xf32>
    %c63 = arith.constant 63 : index
    %c0_409 = arith.constant 0 : index
    %838 = vector.load %arg6[%c63, %c0_409] : memref<64x128xf32, #tpu.memory_space<vmem>>, vector<1x128xf32>
    tpu.vector_store %arg6[%c63, %c0_409], %837 {strides = array<i32>} : memref<64x128xf32, #tpu.memory_space<vmem>>, vector<1x128xf32>,
    %c56_410 = arith.constant 56 : index
    %c0_411 = arith.constant 0 : index
    %839 = vector.load %arg6[%c56_410, %c0_411] : memref<64x128xf32, #tpu.memory_space<vmem>>, vector<8x128xf32>
    %840 = vector.broadcast %782 : vector<1x128xf32> to vector<8x128xf32>
    %841 = arith.mulf %839, %840 : vector<8x128xf32>
    %cst_412 = arith.constant dense<0.000000e+00> : vector<8xf32>
    %842 = vector.multi_reduction <add>, %841, %cst_412 [1] : vector<8x128xf32> to vector<8xf32>
    %843 = vector.shape_cast %842 : vector<8xf32> to vector<8x1xf32>
    %cst_413 = arith.constant -2.000000e+01 : f32
    %cst_414 = arith.constant 2.000000e+01 : f32
    %844 = vector.broadcast %cst_413 : f32 to vector<8x1xf32>
    %845 = arith.maximumf %844, %843 : vector<8x1xf32>
    %846 = vector.broadcast %cst_414 : f32 to vector<8x1xf32>
    %847 = arith.minimumf %846, %845 : vector<8x1xf32>
    %848 = tpu.iota {dimensions = array<i32: 0>} : vector<8x1xi32>
    %c0_i32_415 = arith.constant 0 : i32
    %849 = vector.broadcast %c0_i32_415 : i32 to vector<8x1xi32>
    %850 = arith.cmpi eq, %848, %849 : vector<8x1xi32>
    %cst_416 = arith.constant 0.000000e+00 : f32
    %851 = vector.broadcast %cst_416 : f32 to vector<8x1xf32>
    %852 = arith.subf %851, %847 : vector<8x1xf32>
    %cst_417 = arith.constant 0.000000e+00 : f32
    %853 = vector.broadcast %cst_417 : f32 to vector<8x1xf32>
    %854 = arith.maximumf %852, %853 : vector<8x1xf32>
    %855 = math.absf %852 : vector<8x1xf32>
    %cst_418 = arith.constant 0.000000e+00 : f32
    %856 = vector.broadcast %cst_418 : f32 to vector<8x1xf32>
    %857 = arith.subf %856, %855 : vector<8x1xf32>
    %858 = math.exp %857 : vector<8x1xf32>
    %cst_419 = arith.constant 1.000000e+00 : f32
    %859 = vector.broadcast %cst_419 : f32 to vector<8x1xf32>
    %860 = arith.addf %859, %858 : vector<8x1xf32>
    %861 = math.log %860 : vector<8x1xf32>
    %862 = arith.addf %854, %861 : vector<8x1xf32>
    %cst_420 = arith.constant 0.000000e+00 : f32
    %863 = vector.broadcast %cst_420 : f32 to vector<8x1xf32>
    %864 = arith.subf %863, %862 : vector<8x1xf32>
    %cst_421 = arith.constant 0.000000e+00 : f32
    %865 = vector.broadcast %cst_421 : f32 to vector<8x1xf32>
    %866 = arith.maximumf %847, %865 : vector<8x1xf32>
    %867 = math.absf %847 : vector<8x1xf32>
    %cst_422 = arith.constant 0.000000e+00 : f32
    %868 = vector.broadcast %cst_422 : f32 to vector<8x1xf32>
    %869 = arith.subf %868, %867 : vector<8x1xf32>
    %870 = math.exp %869 : vector<8x1xf32>
    %cst_423 = arith.constant 1.000000e+00 : f32
    %871 = vector.broadcast %cst_423 : f32 to vector<8x1xf32>
    %872 = arith.addf %871, %870 : vector<8x1xf32>
    %873 = math.log %872 : vector<8x1xf32>
    %874 = arith.addf %866, %873 : vector<8x1xf32>
    %cst_424 = arith.constant 0.000000e+00 : f32
    %875 = vector.broadcast %cst_424 : f32 to vector<8x1xf32>
    %876 = arith.subf %875, %874 : vector<8x1xf32>
    %877 = arith.select %850, %864, %876 : vector<8x1xi1>, vector<8x1xf32>
    %878 = vector.shape_cast %877 : vector<8x1xf32> to vector<1x8x1xf32>
    %cst_425 = arith.constant dense<0.000000e+00> : vector<1xf32>
    %879 = vector.multi_reduction <add>, %878, %cst_425 [1, 2] : vector<1x8x1xf32> to vector<1xf32>
    %880 = vector.shape_cast %879 : vector<1xf32> to vector<1x1x1xf32>
    %881 = vector.extract %880[0, 0, 0] : f32 from vector<1x1x1xf32>
    %882 = vector.broadcast %881 : f32 to vector<1x1xf32>
    %cst_426 = arith.constant 8.000000e+00 : f32
    %883 = vector.broadcast %cst_426 : f32 to vector<1x1xf32>
    %884 = arith.divf %882, %883 : vector<1x1xf32>
    %cst_427 = arith.constant 0.000000e+00 : f32
    %885 = vector.broadcast %cst_427 : f32 to vector<1x1xf32>
    %886 = arith.subf %885, %884 : vector<1x1xf32>
    %c7_428 = arith.constant 7 : index
    %c0_429 = arith.constant 0 : index
    %887 = vector.load %arg5[%c7_428, %c0_429] : memref<8x1xf32, #tpu.memory_space<vmem>>, vector<1x1xf32>
    tpu.vector_store %arg5[%c7_428, %c0_429], %886 {strides = array<i32>} : memref<8x1xf32, #tpu.memory_space<vmem>>, vector<1x1xf32>,
    return
  }
  func.func @transform_0(%arg0: i32, %arg1: memref<8xi32, #tpu.memory_space<smem>>, %arg2: memref<64xi32, #tpu.memory_space<smem>>) -> (i32, i32) {
    %c0_i32 = arith.constant 0 : i32
    %c0_i32_0 = arith.constant 0 : i32
    %c0_i32_1 = arith.constant 0 : i32
    return %c0_i32, %c0_i32_0 : i32, i32
  }
  func.func @transform_1(%arg0: i32, %arg1: memref<8xi32, #tpu.memory_space<smem>>, %arg2: memref<64xi32, #tpu.memory_space<smem>>) -> (i32, i32) {
    %c0_i32 = arith.constant 0 : i32
    %c0_i32_0 = arith.constant 0 : i32
    %c0_i32_1 = arith.constant 0 : i32
    return %c0_i32, %c0_i32_0 : i32, i32
  }
  func.func @transform_2(%arg0: i32, %arg1: memref<8xi32, #tpu.memory_space<smem>>, %arg2: memref<64xi32, #tpu.memory_space<smem>>) -> (i32, i32) {
    %c0_i32 = arith.constant 0 : i32
    %c0_i32_0 = arith.constant 0 : i32
    return %arg0, %c0_i32 : i32, i32
  }
}

</mosaic_0001>

<bundles_post_ra>
// kernel: tpu_custom_call.1
= control target key start
LH: loop header
LB: loop body
LE: loop exit
PB: predicated region body
PF: predicated region fallthrough
CT: control target
= control target key end

     0   :  { %s1091_s15 = smov [#allocation4]   ;;  %s1346_s0 = inlined_call_operand.hbm [shape: s32[8], index: 0, kind: input, shape index: {}]   ;;  %s1347_s2 = inlined_call_operand.hbm [shape: f32[16,128], index: 2, kind: input, shape index: {}]   ;;  %s1348_s3 = inlined_call_operand.hbm [shape: f32[16,128], index: 3, kind: input, shape index: {}]   ;;  %s1349_s4 = inlined_call_operand.vmem [shape: f32[8,1], index: 4, kind: output, shape index: {}]   ;;  %s1350_s1 = inlined_call_operand.vmem [shape: s32[64], index: 1, kind: input, shape index: {}]  }
   0x1   :  { %10 = dma.hbm_to_smem %s1346_s0, 16, %s1091_s15, [#allocation3] }
   0x2   :  { %s11_s20 = sshll.u32 %s1350_s1, 4  ;;  %s12_s20 = int_to_ptr.vmem [resolvable:$true] %s11_s20 }
   0x3   :  { %s1033_s21 = scalar_lea.vmem %s12_s20, 16  ;;  %p1038_p1 = scmp.lt.s32.totalorder %s12_s20, %s12_s20 }
   0x4   :  { %p1034_p0 = scmp.ne.s32.totalorder %s12_s20, %s1033_s21  ;;  %p1039_p2 = scmp.lt.s32.totalorder %s1033_s21, %s1033_s21 }
   0x6   :  { %p1040_p3 = por %p1039_p2, %p1038_p1 }
   0x8   :  { %p1041_p4 = pnand %p1040_p3, %p1034_p0 }
   0xa   :  { %1044 = shalt.err (!%p1041_p4)  }
   0xb   :  { %s1092_s22 = smov [#allocation5]  }
   0xc   :  { %14 = dma.vmem_to_smem %s12_s20, 16, %s1092_s22, [#allocation3] }
   0xd   :  { %1085 = dma.done.wait [#allocation3], 32 }
   0xe   :  { %1086 = vsyncadd [#allocation3], 4294967264 }
   0xf   :  { %16 = sfence }
  0x10   :  { %17 = vsyncpa [#allocation7], 0 }
  0x11   :  { %18 = vsyncpa [#allocation9], 0  ;;  %s1093_s0 = smov [#allocation6]  }
  0x12   :  { %s24_s23 = sshll.u32 %s1093_s0, 4  ;;  %s25_s23 = int_to_ptr.vmem [resolvable:$true] %s24_s23 }
  0x13   :  { %s1053_s24 = scalar_lea.vmem %s25_s23, 256  ;;  %p1058_p6 = scmp.lt.s32.totalorder %s25_s23, %s25_s23 }
  0x14   :  { %p1054_p5 = scmp.ne.s32.totalorder %s25_s23, %s1053_s24  ;;  %p1059_p7 = scmp.lt.s32.totalorder %s1053_s24, %s1053_s24 }
  0x16   :  { %p1060_p8 = por %p1059_p7, %p1058_p6 }
  0x18   :  { %p1061_p9 = pnand %p1060_p8, %p1054_p5 }
  0x1a   :  { %1064 = shalt.err (!%p1061_p9)
}
  0x1b   :  { %s1094_s1 = smov 128   ;;  %s1095_s25 = smov 8  }
  0x1c   :  { %30 = dma.hbm_to_vmem [thread:$0]  %s1347_s2, 256, %s25_s23, [#allocation7], %s1094_s1, %s1094_s1, %s1095_s25  }
  0x1d   :  { %s1096_s28 = smov [#allocation8]  }
  0x1e   :  { %s36_s29 = sshll.u32 %s1096_s28, 4  ;;  %s37_s29 = int_to_ptr.vmem [resolvable:$true] %s36_s29 }
  0x1f   :  { %s1073_s30 = scalar_lea.vmem %s37_s29, 256  ;;  %p1078_p11 = scmp.lt.s32.totalorder %s37_s29, %s37_s29 }
  0x20   :  { %p1074_p10 = scmp.ne.s32.totalorder %s37_s29, %s1073_s30  ;;  %p1079_p12 = scmp.lt.s32.totalorder %s1073_s30, %s1073_s30 }
  0x22   :  { %p1080_p13 = por %p1079_p12, %p1078_p11 }
  0x24   :  { %p1081_p0 = pnand %p1080_p13, %p1074_p10 }
  0x26   :  { %1084 = shalt.err (!%p1081_p0)
}
  0x27   :  { %42 = dma.hbm_to_vmem [thread:$0]  %s1348_s3, 256, %s37_s29, [#allocation9], %s1094_s1, %s1094_s1, %s1095_s25  }
  0x28   :  { %1087 = dma.done.wait [#allocation7], 256  }
  0x29   :  { %1088 = vsyncadd [#allocation7], 4294967040 }
  0x2a   :  { %1089 = dma.done.wait [#allocation9], 256  }
  0x2b   :  { %1090 = vsyncadd [#allocation9], 4294967040  ;;  %s1134_s7 = sld [smem:[#allocation4 + $0x2]]  ;;  %vm128_vm0 = vcmask 7168   ;;  %vm143_vm2 = vcmask 0  }
  0x2c   :  { %s874_s2 = sld [smem:[#allocation5 + $0x10]] }
  0x2d   :  { %s875_s8 = sld [smem:[#allocation5 + $0x11]] }
  0x2e   :  { %s876_s9 = sld [smem:[#allocation5 + $0x12]] }
  0x2f   :  { %s877_s10 = sld [smem:[#allocation5 + $0x13]] }
  0x30   :  { %s878_s11 = sld [smem:[#allocation5 + $0x14]] }
  0x31   :  { %s879_s12 = sld [smem:[#allocation5 + $0x15]]  ;;  %s237_s6 = scalar_lea.vmem [#allocation6], %s1134_s7 }
  0x32   :  { %s880_s13 = sld [smem:[#allocation5 + $0x16]]  ;;  %s241_s14 = scalar_lea.vmem [#allocation8], %s874_s2  ;;  %v882_v10 = vld [vmem:[%s237_s6] ss:$0 sm:$0xff] }
  0x33   :  { %v242_v0 = vld [vmem:[%s241_s14] sm:$0x1]  ;;  %s881_s15 = sld [smem:[#allocation5 + $0x17]]  ;;  %s246_s16 = scalar_lea.vmem [#allocation8], %s875_s8 }
  0x34   :  { %243 = vst [vmem:[#allocation2 + $0x10] sm:$0x1] %v242_v0  ;;  %v247_v1 = vld [vmem:[%s246_s16] sm:$0x1]  ;;  %s1136_s3 = sld [smem:[#allocation4]]  ;;  %s251_s17 = scalar_lea.vmem [#allocation8], %s876_s9 }
  0x35   :  { %248 = vst [vmem:[#allocation2 + $0x11] sm:$0x1] %v247_v1  ;;  %v252_v2 = vld [vmem:[%s251_s17] sm:$0x1]  ;;  %s54_s18 = sld [smem:[#allocation5]]  ;;  %s256_s19 = scalar_lea.vmem [#allocation8], %s877_s10 }
  0x36   :  { %253 = vst [vmem:[#allocation2 + $0x12] sm:$0x1] %v252_v2  ;;  %v257_v3 = vld [vmem:[%s256_s19] sm:$0x1]  ;;  %s853_s20 = sld [smem:[#allocation5 + $0x1]]  ;;  %s261_s21 = scalar_lea.vmem [#allocation8], %s878_s11 }
  0x37   :  { %258 = vst [vmem:[#allocation2 + $0x13] sm:$0x1] %v257_v3  ;;  %v262_v4 = vld [vmem:[%s261_s21] sm:$0x1]  ;;  %s854_s22 = sld [smem:[#allocation5 + $0x2]]  ;;  %s266_s0 = scalar_lea.vmem [#allocation8], %s879_s12 }
  0x38   :  { %263 = vst [vmem:[#allocation2 + $0x14] sm:$0x1] %v262_v4  ;;  %v267_v5 = vld [vmem:[%s266_s0] sm:$0x1]  ;;  %s855_s23 = sld [smem:[#allocation5 + $0x3]]  ;;  %s271_s24 = scalar_lea.vmem [#allocation8], %s880_s13 }
  0x39   :  { %268 = vst [vmem:[#allocation2 + $0x15] sm:$0x1] %v267_v5  ;;  %v272_v6 = vld [vmem:[%s271_s24] sm:$0x1]  ;;  %s856_s1 = sld [smem:[#allocation5 + $0x4]]  ;;  %s276_s25 = scalar_lea.vmem [#allocation8], %s881_s15 }
  0x3a   :  { %273 = vst [vmem:[#allocation2 + $0x16] sm:$0x1] %v272_v6  ;;  %v277_v7 = vld [vmem:[%s276_s25] sm:$0x1]  ;;  %s857_s26 = sld [smem:[#allocation5 + $0x5]]  ;;  %s51_s0 = scalar_lea.vmem [#allocation6], %s1136_s3 }
  0x3b   :  { %278 = vst [vmem:[#allocation2 + $0x17] sm:$0x1] %v277_v7  ;;  %s1138_s27 = sld [smem:[#allocation5 + $0x6]]  ;;  %s55_s28 = scalar_lea.vmem [#allocation8], %s54_s18  ;;  %v860_v21 = vld [vmem:[%s51_s0] ss:$0 sm:$0xff] }
  0x3c   :  { %v56_v8 = vld [vmem:[%s55_s28] sm:$0x1]  ;;  %s1140_s29 = sld [smem:[#allocation5 + $0x7]]  ;;  %s60_s30 = scalar_lea.vmem [#allocation8], %s853_s20 }
  0x3d   :  { %57 = vst [vmem:[#allocation2] sm:$0x1] %v56_v8  ;;  %v61_v9 = vld [vmem:[%s60_s30] sm:$0x1]  ;;  %s1142_s5 = sld [smem:[#allocation4 + $0x3]]  ;;  %s65_s2 = scalar_lea.vmem [#allocation8], %s854_s22 }
  0x3e   :  { %62 = vst [vmem:[#allocation2 + $0x1] sm:$0x1] %v61_v9  ;;  %v66_v11 = vld [vmem:[%s65_s2] sm:$0x1]  ;;  %s885_s8 = sld [smem:[#allocation5 + $0x18]]  ;;  %s70_s9 = scalar_lea.vmem [#allocation8], %s855_s23 }
  0x3f   :  { %67 = vst [vmem:[#allocation2 + $0x2] sm:$0x1] %v66_v11  ;;  %v71_v12 = vld [vmem:[%s70_s9] sm:$0x1]  ;;  %s886_s10 = sld [smem:[#allocation5 + $0x19]]  ;;  %s75_s11 = scalar_lea.vmem [#allocation8], %s856_s1 }
  0x40   :  { %72 = vst [vmem:[#allocation2 + $0x3] sm:$0x1] %v71_v12  ;;  %v76_v13 = vld [vmem:[%s75_s11] sm:$0x1]  ;;  %s1145_s12 = sld [smem:[#allocation5 + $0x1a]]  ;;  %s80_s13 = scalar_lea.vmem [#allocation8], %s857_s26 }
  0x41   :  { %77 = vst [vmem:[#allocation2 + $0x4] sm:$0x1] %v76_v13  ;;  %v81_v14 = vld [vmem:[%s80_s13] sm:$0x1]  ;;  %s1147_s7 = sld [smem:[#allocation5 + $0x1b]]  ;;  %s85_s14 = scalar_lea.vmem [#allocation8], %s1138_s27 }
  0x42   :  { %v279_v15 = vld [vmem:[#allocation2 + $0x10] sm:$0xff]  ;;  %82 = vst [vmem:[#allocation2 + $0x5] sm:$0x1] %v81_v14  ;;  %v86_v16 = vld [vmem:[%s85_s14] sm:$0x1]  ;;  %s889_s15 = sld [smem:[#allocation5 + $0x1c]] }
  0x43   :  { %v284_v17 = vmul.f32 %v882_v10, %v279_v15  ;;  %87 = vst [vmem:[#allocation2 + $0x6] sm:$0x1] %v86_v16  ;;  %s90_s16 = scalar_lea.vmem [#allocation8], %s1140_s29  ;;  %s890_s17 = sld [smem:[#allocation5 + $0x1d]] }
  0x44   :  { %v91_v18 = vld [vmem:[%s90_s16] sm:$0x1]  ;;  %s1151_s18 = sld [smem:[#allocation5 + $0x1e]]  ;;  %s331_s19 = scalar_lea.vmem [#allocation8], %s885_s8 }
  0x45   :  { %92 = vst [vmem:[#allocation2 + $0x7] sm:$0x1] %v91_v18  ;;  %285 = vadd.xlane.f32.xlu1 %v284_v17  ;;  %v332_v19 = vld [vmem:[%s331_s19] sm:$0x1]  ;;  %s1153_s20 = sld [smem:[#allocation5 + $0x1f]]  ;;  %s336_s21 = scalar_lea.vmem [#allocation8], %s886_s10 }
  0x46   :  { %333 = vst [vmem:[#allocation2 + $0x18] sm:$0x1] %v332_v19  ;;  %v337_v20 = vld [vmem:[%s336_s21] sm:$0x1]  ;;  %s1155_s22 = sld [smem:[#allocation4 + $0x1]]  ;;  %s341_s23 = scalar_lea.vmem [#allocation8], %s1145_s12 }
  0x47   :  { %338 = vst [vmem:[#allocation2 + $0x19] sm:$0x1] %v337_v20  ;;  %v342_v22 = vld [vmem:[%s341_s23] sm:$0x1]  ;;  %s863_s24 = sld [smem:[#allocation5 + $0x8]]  ;;  %s346_s1 = scalar_lea.vmem [#allocation8], %s1147_s7 }
  0x48   :  { %343 = vst [vmem:[#allocation2 + $0x1a] sm:$0x1] %v342_v22  ;;  %v347_v23 = vld [vmem:[%s346_s1] sm:$0x1]  ;;  %s864_s25 = sld [smem:[#allocation5 + $0x9]]  ;;  %s351_s26 = scalar_lea.vmem [#allocation8], %s889_s15 }
  0x49   :  { %348 = vst [vmem:[#allocation2 + $0x1b] sm:$0x1] %v347_v23  ;;  %v352_v24 = vld [vmem:[%s351_s26] sm:$0x1]  ;;  %s1160_s27 = sld [smem:[#allocation5 + $0xa]]  ;;  %s356_s28 = scalar_lea.vmem [#allocation8], %s890_s17 }
  0x4a   :  { %353 = vst [vmem:[#allocation2 + $0x1c] sm:$0x1] %v352_v24  ;;  %v357_v25 = vld [vmem:[%s356_s28] sm:$0x1]  ;;  %s1162_s3 = sld [smem:[#allocation5 + $0xb]]  ;;  %s361_s29 = scalar_lea.vmem [#allocation8], %s1151_s18 }
  0x4b   :  { %358 = vst [vmem:[#allocation2 + $0x1d] sm:$0x1] %v357_v25  ;;  %v362_v27 = vld [vmem:[%s361_s29] sm:$0x1]  ;;  %s867_s30 = sld [smem:[#allocation5 + $0xc]]  ;;  %s366_s6 = scalar_lea.vmem [#allocation8], %s1153_s20 }
  0x4c   :  { %v93_v26 = vld [vmem:[#allocation2] sm:$0xff]  ;;  %363 = vst [vmem:[#allocation2 + $0x1e] sm:$0x1] %v362_v27  ;;  %s868_s2 = sld [smem:[#allocation5 + $0xd]]  ;;  %s327_s13 = scalar_lea.vmem [#allocation6], %s1142_s5 }
  0x4d   :  { %v98_v28 = vmul.f32 %v860_v21, %v93_v26  ;;  %v367_v29 = vld [vmem:[%s366_s6] sm:$0x1]  ;;  %s1166_s8 = sld [smem:[#allocation5 + $0xe]]  ;;  %s151_s9 = scalar_lea.vmem [#allocation8], %s863_s24 }
  0x4e   :  { %368 = vst [vmem:[#allocation2 + $0x1f] sm:$0x1] %v367_v29  ;;  %v152_v30 = vld [vmem:[%s151_s9] sm:$0x1]  ;;  %s1168_s10 = sld [smem:[#allocation5 + $0xf]]  ;;  %s156_s11 = scalar_lea.vmem [#allocation8], %s864_s25 }
  0x4f   :  { %99 = vadd.xlane.f32.xlu0 %v98_v28  ;;  %153 = vst [vmem:[#allocation2 + $0x8] sm:$0x1] %v152_v30  ;;  %v157_v31 = vld [vmem:[%s156_s11] sm:$0x1]  ;;  %s1170_s12 = sld [smem:[#allocation4 + $0x5]]  ;;  %s161_s7 = scalar_lea.vmem [#allocation8], %s1160_s27 }
  0x50   :  { %v893_v32 = vld [vmem:[%s327_s13] ss:$0 sm:$0xff]  ;;  %158 = vst [vmem:[#allocation2 + $0x9] sm:$0x1] %v157_v31  ;;  %s907_s14 = sld [smem:[#allocation5 + $0x28]]  ;;  %s166_s15 = scalar_lea.vmem [#allocation8], %s1162_s3 }
  0x51   :  { %v162_v33 = vld [vmem:[%s161_s7] sm:$0x1]  ;;  %s908_s16 = sld [smem:[#allocation5 + $0x29]]  ;;  %s171_s17 = scalar_lea.vmem [#allocation8], %s867_s30 }
  0x52   :  { %163 = vst [vmem:[#allocation2 + $0xa] sm:$0x1] %v162_v33  ;;  %v167_v34 = vld [vmem:[%s166_s15] sm:$0x1]  ;;  %s1175_s18 = sld [smem:[#allocation5 + $0x2a]]  ;;  %s176_s19 = scalar_lea.vmem [#allocation8], %s868_s2 }
  0x53   :  { %168 = vst [vmem:[#allocation2 + $0xb] sm:$0x1] %v167_v34  ;;  %v172_v35 = vld [vmem:[%s171_s17] sm:$0x1]  ;;  %s1177_s5 = sld [smem:[#allocation5 + $0x2b]]  ;;  %s181_s20 = scalar_lea.vmem [#allocation8], %s1166_s8 }
  0x54   :  { %173 = vst [vmem:[#allocation2 + $0xc] sm:$0x1] %v172_v35  ;;  %v177_v36 = vld [vmem:[%s176_s19] sm:$0x1]  ;;  %s911_s21 = sld [smem:[#allocation5 + $0x2c]]  ;;  %s186_s0 = scalar_lea.vmem [#allocation8], %s1168_s10 }
  0x55   :  { %v369_v37 = vld [vmem:[#allocation2 + $0x18] sm:$0xff]  ;;  %178 = vst [vmem:[#allocation2 + $0xd] sm:$0x1] %v177_v36  ;;  %v182_v38 = vld [vmem:[%s181_s20] sm:$0x1]  ;;  %s912_s23 = sld [smem:[#allocation5 + $0x2d]] }
  0x56   :  { %v374_v39 = vmul.f32 %v893_v32, %v369_v37  ;;  %183 = vst [vmem:[#allocation2 + $0xe] sm:$0x1] %v182_v38  ;;  %v187_v40 = vld [vmem:[%s186_s0] sm:$0x1]  ;;  %s1181_s24 = sld [smem:[#allocation5 + $0x2e]]  ;;  %s511_s1 = scalar_lea.vmem [#allocation8], %s907_s14 }
  0x57   :  { %188 = vst [vmem:[#allocation2 + $0xf] sm:$0x1] %v187_v40  ;;  %v512_v41 = vld [vmem:[%s511_s1] sm:$0x1]  ;;  %s1183_s25 = sld [smem:[#allocation5 + $0x2f]]  ;;  %s516_s26 = scalar_lea.vmem [#allocation8], %s908_s16 }
  0x58   :  { %375 = vadd.xlane.f32.xlu1 %v374_v39  ;;  %513 = vst [vmem:[#allocation2 + $0x28] sm:$0x1] %v512_v41  ;;  %v517_v42 = vld [vmem:[%s516_s26] sm:$0x1]  ;;  %s1185_s27 = sld [smem:[#allocation4 + $0x4]]  ;;  %s147_s28 = scalar_lea.vmem [#allocation6], %s1155_s22 }
  0x59   :  { %v871_v43 = vld [vmem:[%s147_s28] ss:$0 sm:$0xff]  ;;  %518 = vst [vmem:[#allocation2 + $0x29] sm:$0x1] %v517_v42  ;;  %s521_s3 = scalar_lea.vmem [#allocation8], %s1175_s18  ;;  %s896_s29 = sld [smem:[#allocation5 + $0x20]] }
  0x5a   :  { %v522_v44 = vld [vmem:[%s521_s3] sm:$0x1]  ;;  %s526_s30 = scalar_lea.vmem [#allocation8], %s1177_s5  ;;  %s897_s6 = sld [smem:[#allocation5 + $0x21]] }
  0x5b   :  { %523 = vst [vmem:[#allocation2 + $0x2a] sm:$0x1] %v522_v44  ;;  %v527_v45 = vld [vmem:[%s526_s30] sm:$0x1]  ;;  %s531_s2 = scalar_lea.vmem [#allocation8], %s911_s21  ;;  %s898_s8 = sld [smem:[#allocation5 + $0x22]] }
  0x5c   :  { %528 = vst [vmem:[#allocation2 + $0x2b] sm:$0x1] %v527_v45  ;;  %v532_v46 = vld [vmem:[%s531_s2] sm:$0x1]  ;;  %s536_s9 = scalar_lea.vmem [#allocation8], %s912_s23  ;;  %s899_s10 = sld [smem:[#allocation5 + $0x23]] }
  0x5d   :  { %533 = vst [vmem:[#allocation2 + $0x2c] sm:$0x1] %v532_v46  ;;  %v537_v47 = vld [vmem:[%s536_s9] sm:$0x1]  ;;  %s541_s22 = scalar_lea.vmem [#allocation8], %s1181_s24  ;;  %s900_s11 = sld [smem:[#allocation5 + $0x24]] }
  0x5e   :  { %v189_v48 = vld [vmem:[#allocation2 + $0x8] sm:$0xff]  ;;  %538 = vst [vmem:[#allocation2 + $0x2d] sm:$0x1] %v537_v47  ;;  %v542_v49 = vld [vmem:[%s541_s22] sm:$0x1]  ;;  %s546_s13 = scalar_lea.vmem [#allocation8], %s1183_s25 }
  0x5f   :  { %v194_v50 = vmul.f32 %v871_v43, %v189_v48  ;;  %543 = vst [vmem:[#allocation2 + $0x2e] sm:$0x1] %v542_v49  ;;  %v547_v51 = vld [vmem:[%s546_s13] sm:$0x1]  ;;  %s901_s7 = sld [smem:[#allocation5 + $0x25]]  ;;  %s421_s15 = scalar_lea.vmem [#allocation8], %s896_s29 }
  0x60   :  { %548 = vst [vmem:[#allocation2 + $0x2f] sm:$0x1] %v547_v51  ;;  %s1192_s14 = sld [smem:[#allocation5 + $0x26]]  ;;  %v422_v52 = vld [vmem:[%s421_s15] sm:$0x1]  ;;  %s426_s17 = scalar_lea.vmem [#allocation8], %s897_s6 }
  0x61   :  { %195 = vadd.xlane.f32.xlu0 %v194_v50  ;;  %s1194_s16 = sld [smem:[#allocation5 + $0x27]]  ;;  %423 = vst [vmem:[#allocation2 + $0x20] sm:$0x1] %v422_v52  ;;  %v427_v53 = vld [vmem:[%s426_s17] sm:$0x1]  ;;  %s507_s18 = scalar_lea.vmem [#allocation6], %s1170_s12 }
  0x62   :  { %v915_v54 = vld [vmem:[%s507_s18] ss:$0 sm:$0xff]  ;;  %428 = vst [vmem:[#allocation2 + $0x21] sm:$0x1] %v427_v53  ;;  %s431_s19 = scalar_lea.vmem [#allocation8], %s898_s8  ;;  %s929_s5 = sld [smem:[#allocation5 + $0x38]] }
  0x63   :  { %v432_v55 = vld [vmem:[%s431_s19] sm:$0x1]  ;;  %s436_s20 = scalar_lea.vmem [#allocation8], %s899_s10  ;;  %s930_s21 = sld [smem:[#allocation5 + $0x39]] }
  0x64   :  { %433 = vst [vmem:[#allocation2 + $0x22] sm:$0x1] %v432_v55  ;;  %v437_v56 = vld [vmem:[%s436_s20] sm:$0x1]  ;;  %s441_s0 = scalar_lea.vmem [#allocation8], %s900_s11  ;;  %s1197_s23 = sld [smem:[#allocation5 + $0x3a]] }
  0x65   :  { %438 = vst [vmem:[#allocation2 + $0x23] sm:$0x1] %v437_v56  ;;  %v442_v57 = vld [vmem:[%s441_s0] sm:$0x1]  ;;  %s446_s24 = scalar_lea.vmem [#allocation8], %s901_s7  ;;  %s1199_s12 = sld [smem:[#allocation5 + $0x3b]] }
  0x66   :  { %443 = vst [vmem:[#allocation2 + $0x24] sm:$0x1] %v442_v57  ;;  %v447_v58 = vld [vmem:[%s446_s24] sm:$0x1]  ;;  %s451_s1 = scalar_lea.vmem [#allocation8], %s1192_s14  ;;  %s933_s25 = sld [smem:[#allocation5 + $0x3c]] }
  0x67   :  { %v549_v59 = vld [vmem:[#allocation2 + $0x28] sm:$0xff]  ;;  %448 = vst [vmem:[#allocation2 + $0x25] sm:$0x1] %v447_v58  ;;  %v452_v60 = vld [vmem:[%s451_s1] sm:$0x1]  ;;  %s456_s26 = scalar_lea.vmem [#allocation8], %s1194_s16 }
  0x68   :  { %v554_v61 = vmul.f32 %v915_v54, %v549_v59  ;;  %453 = vst [vmem:[#allocation2 + $0x26] sm:$0x1] %v452_v60  ;;  %v457_v62 = vld [vmem:[%s456_s26] sm:$0x1]  ;;  %s934_s28 = sld [smem:[#allocation5 + $0x3d]]  ;;  %s691_s29 = scalar_lea.vmem [#allocation8], %s929_s5 }
  0x69   :  { %458 = vst [vmem:[#allocation2 + $0x27] sm:$0x1] %v457_v62  ;;  %s1203_s3 = sld [smem:[#allocation5 + $0x3e]]  ;;  %v692_v63 = vld [vmem:[%s691_s29] sm:$0x1]  ;;  %s696_s2 = scalar_lea.vmem [#allocation8], %s930_s21 }
  0x6a   :  { %555 = vadd.xlane.f32.xlu1 %v554_v61  ;;  %s1205_s30 = sld [smem:[#allocation5 + $0x3f]]  ;;  %693 = vst [vmem:[#allocation2 + $0x38] sm:$0x1] %v692_v63  ;;  %v697_v0 = vld [vmem:[%s696_s2] sm:$0x1]  ;;  %s417_s8 = scalar_lea.vmem [#allocation6], %s1185_s27 }
  0x6b   :  { %s1207_s6 = sld [smem:[#allocation4 + $0x7]]  ;;  %v904_v1 = vld [vmem:[%s417_s8] ss:$0 sm:$0xff]  ;;  %698 = vst [vmem:[#allocation2 + $0x39] sm:$0x1] %v697_v0  ;;  %s701_s9 = scalar_lea.vmem [#allocation8], %s1197_s23 }
  0x6c   :  { %v702_v2 = vld [vmem:[%s701_s9] sm:$0x1]  ;;  %s918_s10 = sld [smem:[#allocation5 + $0x30]]  ;;  %s706_s22 = scalar_lea.vmem [#allocation8], %s1199_s12 }
  0x6d   :  { %703 = vst [vmem:[#allocation2 + $0x3a] sm:$0x1] %v702_v2  ;;  %v707_v3 = vld [vmem:[%s706_s22] sm:$0x1]  ;;  %s919_s11 = sld [smem:[#allocation5 + $0x31]]  ;;  %s711_s13 = scalar_lea.vmem [#allocation8], %s933_s25 }
  0x6e   :  { %708 = vst [vmem:[#allocation2 + $0x3b] sm:$0x1] %v707_v3  ;;  %v712_v4 = vld [vmem:[%s711_s13] sm:$0x1]  ;;  %s920_s7 = sld [smem:[#allocation5 + $0x32]]  ;;  %s716_s14 = scalar_lea.vmem [#allocation8], %s934_s28 }
  0x6f   :  { %713 = vst [vmem:[#allocation2 + $0x3c] sm:$0x1] %v712_v4  ;;  %v717_v5 = vld [vmem:[%s716_s14] sm:$0x1]  ;;  %s921_s15 = sld [smem:[#allocation5 + $0x33]]  ;;  %s721_s27 = scalar_lea.vmem [#allocation8], %s1203_s3 }
  0x70   :  { %v459_v6 = vld [vmem:[#allocation2 + $0x20] sm:$0xff]  ;;  %718 = vst [vmem:[#allocation2 + $0x3d] sm:$0x1] %v717_v5  ;;  %s922_s16 = sld [smem:[#allocation5 + $0x34]]  ;;  %s726_s17 = scalar_lea.vmem [#allocation8], %s1205_s30 }
  0x71   :  { %v722_v7 = vld [vmem:[%s721_s27] sm:$0x1]  ;;  %v464_v8 = vmul.f32 %v904_v1, %v459_v6  ;;  %s923_s18 = sld [smem:[#allocation5 + $0x35]]  ;;  %s687_s12 = scalar_lea.vmem [#allocation6], %s1207_s6 }
  0x72   :  { %723 = vst [vmem:[#allocation2 + $0x3e] sm:$0x1] %v722_v7  ;;  %v727_v9 = vld [vmem:[%s726_s17] sm:$0x1]  ;;  %s924_s19 = sld [smem:[#allocation5 + $0x36]]  ;;  %s601_s5 = scalar_lea.vmem [#allocation8], %s918_s10 }
  0x73   :  { %728 = vst [vmem:[#allocation2 + $0x3f] sm:$0x1] %v727_v9  ;;  %465 = vadd.xlane.f32.xlu0 %v464_v8  ;;  %v602_v10 = vld [vmem:[%s601_s5] sm:$0x1]  ;;  %s925_s20 = sld [smem:[#allocation5 + $0x37]]  ;;  %s606_s21 = scalar_lea.vmem [#allocation8], %s919_s11 }
  0x74   :  { %603 = vst [vmem:[#allocation2 + $0x30] sm:$0x1] %v602_v10  ;;  %v607_v11 = vld [vmem:[%s606_s21] sm:$0x1]  ;;  %s917_s0 = sld [smem:[#allocation4 + $0x6]]  ;;  %s611_s23 = scalar_lea.vmem [#allocation8], %s920_s7 }
  0x75   :  { %608 = vst [vmem:[#allocation2 + $0x31] sm:$0x1] %v607_v11  ;;  %v612_v12 = vld [vmem:[%s611_s23] sm:$0x1]  ;;  %s616_s24 = scalar_lea.vmem [#allocation8], %s921_s15 }
  0x76   :  { %613 = vst [vmem:[#allocation2 + $0x32] sm:$0x1] %v612_v12  ;;  %v617_v13 = vld [vmem:[%s616_s24] sm:$0x1]  ;;  %s621_s1 = scalar_lea.vmem [#allocation8], %s922_s16 }
  0x77   :  { %v937_v14 = vld [vmem:[%s687_s12] ss:$0 sm:$0xff]  ;;  %618 = vst [vmem:[#allocation2 + $0x33] sm:$0x1] %v617_v13  ;;  %s626_s25 = scalar_lea.vmem [#allocation8], %s923_s18 }
  0x78   :  { %v622_v15 = vld [vmem:[%s621_s1] sm:$0x1]  ;;  %s631_s26 = scalar_lea.vmem [#allocation8], %s924_s19 }
  0x79   :  { %623 = vst [vmem:[#allocation2 + $0x34] sm:$0x1] %v622_v15  ;;  %v627_v16 = vld [vmem:[%s626_s25] sm:$0x1]  ;;  %s636_s28 = scalar_lea.vmem [#allocation8], %s925_s20 }
  0x7a   :  { %v729_v17 = vld [vmem:[#allocation2 + $0x38] sm:$0xff]  ;;  %628 = vst [vmem:[#allocation2 + $0x35] sm:$0x1] %v627_v16  ;;  %v632_v18 = vld [vmem:[%s631_s26] sm:$0x1]  ;;  %s597_s3 = scalar_lea.vmem [#allocation6], %s917_s0 }
  0x7b   :  { %v734_v19 = vmul.f32 %v937_v14, %v729_v17  ;;  %633 = vst [vmem:[#allocation2 + $0x36] sm:$0x1] %v632_v18  ;;  %v637_v20 = vld [vmem:[%s636_s28] sm:$0x1]  ;;  %v103_v14 = vlaneseq }
  0x7c   :  { %638 = vst [vmem:[#allocation2 + $0x37] sm:$0x1] %v637_v20  ;;  %v926_v21 = vld [vmem:[%s597_s3] ss:$0 sm:$0xff] }
  0x7d   :  { %735 = vadd.xlane.f32.xlu1 %v734_v19 }
  0x83   :  { %v639_v22 = vld [vmem:[#allocation2 + $0x30] sm:$0xff] }
  0x84   :  { %v644_v23 = vmul.f32 %v926_v21, %v639_v22 }
  0x86   :  { %645 = vadd.xlane.f32.xlu0 %v644_v23 }
  0xce   :  { %v286_v24 = vpop.xlane.xlu1 %285 }
  0xcf   :  { %v1215_v25 = vclamps-f32 %v286_v24, 20.0  ;;  %v1247_v24 = vshrl.u32 %v103_v14, 7 }
  0xd1   :  { %v289_v26 = vsub.f32 0.0, %v1215_v25  ;;  %v301_v27 = vand.u32 2147483647, %v1215_v25  ;;  %vm105_vm1 = vcmp.eq.s32.totalorder %v1247_v24, 0 }
  0xd3   :  { %v291_v28 = vand.u32 2147483647, %v289_v26  ;;  %v302_v29 = vsub.f32 0.0, %v301_v27  ;;  %v290_v27 = vmax.f32 %v289_v26, 0.0 }
  0xd5   :  { %v292_v30 = vsub.f32 0.0, %v291_v28  ;;  %v303_v32 = vmul.f32 1.442695, %v302_v29 }
  0xd7   :  { %v293_v31 = vmul.f32 1.442695, %v292_v30 }
  0xd8   :  { %v100_v33 = vpop.xlane.xlu0 %99 }
  0xd9   :  { %v1221_v34 = vclamps-f32 %v100_v33, 20.0  ;;  %961 = vpow2.f32 %v293_v31 }
  0xda   :  { %963 = vpow2.f32 %v303_v32  ;;  %v300_v32 = vmax.f32 %v1215_v25, 0.0 }
  0xdb   :  { %v106_v35 = vsub.f32 0.0, %v1221_v34  ;;  %v118_v36 = vand.u32 2147483647, %v1221_v34  ;;  %v117_v33 = vmax.f32 %v1221_v34, 0.0 }
  0xdd   :  { %v108_v37 = vand.u32 2147483647, %v106_v35  ;;  %v119_v38 = vsub.f32 0.0, %v118_v36 }
  0xdf   :  { %v109_v39 = vsub.f32 0.0, %v108_v37  ;;  %v120_v40 = vmul.f32 1.442695, %v119_v38 }
  0xe1   :  { %v110_v41 = vmul.f32 1.442695, %v109_v39  ;;  %965 = vpow2.f32 %v120_v40  ;;  %v376_v42 = vpop.xlane.xlu1 %375 }
  0xe2   :  { %v1227_v43 = vclamps-f32 %v376_v42, 20.0  ;;  %v107_v42 = vmax.f32 %v106_v35, 0.0 }
  0xe3   :  { %967 = vpow2.f32 %v110_v41 }
  0xe4   :  { %v379_v44 = vsub.f32 0.0, %v1227_v43  ;;  %v391_v45 = vand.u32 2147483647, %v1227_v43 }
  0xe6   :  { %v381_v46 = vand.u32 2147483647, %v379_v44  ;;  %v392_v47 = vsub.f32 0.0, %v391_v45  ;;  %v962_v48 = vpop.eup %961 }
  0xe7   :  { %v964_v50 = vpop.eup %963  ;;  %v295_v51 = vadd.f32 1.0, %v962_v48 }
  0xe8   :  { %v382_v49 = vsub.f32 0.0, %v381_v46  ;;  %v393_v53 = vmul.f32 1.442695, %v392_v47  ;;  %v305_v56 = vadd.f32 1.0, %v964_v50 }
  0xea   :  { %v383_v52 = vmul.f32 1.442695, %v382_v49  ;;  %v196_v54 = vpop.xlane.xlu0 %195 }
  0xeb   :  { %v1233_v55 = vclamps-f32 %v196_v54, 20.0 }
  0xec   :  { %969 = vpow2.f32 %v383_v52 }
  0xed   :  { %v199_v57 = vsub.f32 0.0, %v1233_v55  ;;  %v211_v58 = vand.u32 2147483647, %v1233_v55  ;;  %971 = vlog2.f32 %v295_v51 }
  0xee   :  { %v966_v59 = vpop.eup %965  ;;  %973 = vpow2.f32 %v393_v53 }
  0xef   :  { %v122_v60 = vadd.f32 1.0, %v966_v59  ;;  %v201_v61 = vand.u32 2147483647, %v199_v57  ;;  %v212_v62 = vsub.f32 0.0, %v211_v58  ;;  %975 = vlog2.f32 %v305_v56 }
  0xf0   :  { %v968_v63 = vpop.eup %967 }
  0xf1   :  { %v112_v0 = vadd.f32 1.0, %v968_v63  ;;  %977 = vlog2.f32 %v122_v60  ;;  %v202_v1 = vsub.f32 0.0, %v201_v61  ;;  %v213_v2 = vmul.f32 1.442695, %v212_v62 }
  0xf3   :  { %v203_v3 = vmul.f32 1.442695, %v202_v1  ;;  %979 = vpow2.f32 %v213_v2  ;;  %v556_v4 = vpop.xlane.xlu1 %555 }
  0xf4   :  { %v1239_v5 = vclamps-f32 %v556_v4, 20.0  ;;  %981 = vlog2.f32 %v112_v0 }
  0xf5   :  { %983 = vpow2.f32 %v203_v3 }
  0xf6   :  { %v559_v6 = vsub.f32 0.0, %v1239_v5  ;;  %v571_v7 = vand.u32 2147483647, %v1239_v5 }
  0xf8   :  { %v561_v8 = vand.u32 2147483647, %v559_v6  ;;  %v572_v9 = vsub.f32 0.0, %v571_v7 }
  0xf9   :  { %v970_v10 = vpop.eup %969 }
  0xfa   :  { %v972_v11 = vpop.eup %971  ;;  %v562_v12 = vsub.f32 0.0, %v561_v8  ;;  %v573_v13 = vmul.f32 1.442695, %v572_v9  ;;  %v385_v16 = vadd.f32 1.0, %v970_v10 }
  0xfb   :  { %v974_v15 = vpop.eup %973  ;;  %v297_v21 = vmul.f32 0.6931472, %v972_v11 }
  0xfc   :  { %v563_v17 = vmul.f32 1.442695, %v562_v12  ;;  %985 = vpow2.f32 %v573_v13  ;;  %v466_v18 = vpop.xlane.xlu0 %465  ;;  %v976_v19 = vpop.eup %975  ;;  %v395_v23 = vadd.f32 1.0, %v974_v15 }
  0xfd   :  { %v1245_v20 = vclamps-f32 %v466_v18, 20.0  ;;  %v307_v36 = vmul.f32 0.6931472, %v976_v19  ;;  %v298_v41 = vadd.f32 %v297_v21, %v290_v27 }
  0xfe   :  { %v978_v22 = vpop.eup %977  ;;  %987 = vpow2.f32 %v563_v17 }
  0xff   :  { %v469_v28 = vsub.f32 0.0, %v1245_v20  ;;  %v481_v29 = vand.u32 2147483647, %v1245_v20  ;;  %v124_v30 = vmul.f32 0.6931472, %v978_v22  ;;  %989 = vlog2.f32 %v385_v16 }
 0x100   :  { %v980_v31 = vpop.eup %979  ;;  %991 = vlog2.f32 %v395_v23  ;;  %v308_v50 = vadd.f32 %v307_v36, %v300_v32  ;;  %v299_v53 = vsub.f32 0.0, %v298_v41  ;;  %v380_v22 = vmax.f32 %v379_v44, 0.0 }
 0x101   :  { %v982_v37 = vpop.eup %981  ;;  %v215_v38 = vadd.f32 1.0, %v980_v31  ;;  %v471_v39 = vand.u32 2147483647, %v469_v28  ;;  %v482_v40 = vsub.f32 0.0, %v481_v29  ;;  %v125_v46 = vadd.f32 %v124_v30, %v117_v33 }
 0x102   :  { %v984_v26 = vpop.eup %983  ;;  %v114_v45 = vmul.f32 0.6931472, %v982_v37  ;;  %v309_v60 = vsub.f32 0.0, %v308_v50  ;;  %v210_v23 = vmax.f32 %v1233_v55, 0.0  ;;  %v390_v30 = vmax.f32 %v1227_v43, 0.0 }
 0x103   :  { %v205_v47 = vadd.f32 1.0, %v984_v26  ;;  %993 = vlog2.f32 %v215_v38  ;;  %v472_v25 = vsub.f32 0.0, %v471_v39  ;;  %v483_v48 = vmul.f32 1.442695, %v482_v40 }
 0x104   :  { %v115_v49 = vadd.f32 %v114_v45, %v107_v42  ;;  %v126_v35 = vsub.f32 0.0, %v125_v46  ;;  %v310_v2 = vsel %vm105_vm1, %v299_v53, %v309_v60  ;;  %v200_v37 = vmax.f32 %v199_v57, 0.0 }
 0x105   :  { %v473_v51 = vmul.f32 1.442695, %v472_v25  ;;  %995 = vpow2.f32 %v483_v48  ;;  %v311_v10 = vsel %vm128_vm0, %v310_v2, 0.0 }
 0x106   :  { %v736_v52 = vpop.xlane.xlu1 %735  ;;  %v116_v34 = vsub.f32 0.0, %v115_v49  ;;  %997 = vlog2.f32 %v205_v47 }
 0x107   :  { %v1260_v54 = vclamps-f32 %v736_v52, 20.0  ;;  %999 = vpow2.f32 %v473_v51  ;;  %v570_v51 = vmax.f32 %v1239_v5, 0.0  ;;  %v480_v5 = vmax.f32 %v1245_v20, 0.0 }
 0x108   :  { %v127_v59 = vsel %vm105_vm1, %v116_v34, %v126_v35 }
 0x109   :  { %v739_v56 = vsub.f32 0.0, %v1260_v54  ;;  %v751_v58 = vand.u32 2147483647, %v1260_v54  ;;  %v986_v61 = vpop.eup %985  ;;  %v129_v62 = vsel %vm128_vm0, %v127_v59, 0.0  ;;  %v560_v59 = vmax.f32 %v559_v6, 0.0 }
 0x10a   :  { %v575_v63 = vadd.f32 1.0, %v986_v61  ;;  %130 = vadd.xlane.f32.xlu0 %v129_v62 }
 0x10b   :  { %v741_v0 = vand.u32 2147483647, %v739_v56  ;;  %v752_v1 = vsub.f32 0.0, %v751_v58  ;;  %v988_v3 = vpop.eup %987  ;;  %v740_v20 = vmax.f32 %v739_v56, 0.0 }
 0x10c   :  { %v565_v4 = vadd.f32 1.0, %v988_v3  ;;  %1001 = vlog2.f32 %v575_v63  ;;  %v990_v9 = vpop.eup %989 }
 0x10d   :  { %v742_v7 = vsub.f32 0.0, %v741_v0  ;;  %v753_v8 = vmul.f32 1.442695, %v752_v1  ;;  %v992_v13 = vpop.eup %991  ;;  %v387_v16 = vmul.f32 0.6931472, %v990_v9 }
 0x10e   :  { %312 = vadd.xlane.f32.xlu0 %v311_v10  ;;  %v397_v27 = vmul.f32 0.6931472, %v992_v13 }
 0x10f   :  { %v743_v11 = vmul.f32 1.442695, %v742_v7  ;;  %1003 = vpow2.f32 %v753_v8  ;;  %v646_v12 = vpop.xlane.xlu0 %645  ;;  %v388_v40 = vadd.f32 %v387_v16, %v380_v22 }
 0x110   :  { %v1272_v14 = vclamps-f32 %v646_v12, 20.0  ;;  %1005 = vlog2.f32 %v565_v4  ;;  %v994_v15 = vpop.eup %993  ;;  %v398_v45 = vadd.f32 %v397_v27, %v390_v30  ;;  %v470_v12 = vmax.f32 %v469_v28, 0.0 }
 0x111   :  { %1007 = vpow2.f32 %v743_v11  ;;  %v217_v19 = vmul.f32 0.6931472, %v994_v15  ;;  %v389_v25 = vsub.f32 0.0, %v388_v40 }
 0x112   :  { %v649_v17 = vsub.f32 0.0, %v1272_v14  ;;  %v661_v18 = vand.u32 2147483647, %v1272_v14  ;;  %v996_v21 = vpop.eup %995  ;;  %v399_v57 = vsub.f32 0.0, %v398_v45  ;;  %v660_v40 = vmax.f32 %v1272_v14, 0.0 }
 0x113   :  { %v998_v29 = vpop.eup %997  ;;  %v485_v31 = vadd.f32 1.0, %v996_v21  ;;  %v218_v39 = vadd.f32 %v217_v19, %v210_v23  ;;  %v750_v23 = vmax.f32 %v1260_v54, 0.0 }
 0x114   :  { %v651_v32 = vand.u32 2147483647, %v649_v17  ;;  %v662_v33 = vsub.f32 0.0, %v661_v18  ;;  %v1000_v36 = vpop.eup %999  ;;  %v207_v38 = vmul.f32 0.6931472, %v998_v29  ;;  %v400_v35 = vsel %vm105_vm1, %v389_v25, %v399_v57 }
 0x115   :  { %v475_v41 = vadd.f32 1.0, %v1000_v36  ;;  %1009 = vlog2.f32 %v485_v31  ;;  %v219_v47 = vsub.f32 0.0, %v218_v39  ;;  %v401_v63 = vsel %vm128_vm0, %v400_v35, 0.0 }
 0x116   :  { %v652_v44 = vsub.f32 0.0, %v651_v32  ;;  %v663_v26 = vmul.f32 1.442695, %v662_v33  ;;  %v208_v42 = vadd.f32 %v207_v38, %v200_v37  ;;  %v650_v54 = vmax.f32 %v649_v17, 0.0 }
 0x118   :  { %v653_v46 = vmul.f32 1.442695, %v652_v44  ;;  %1011 = vpow2.f32 %v663_v26  ;;  %v209_v43 = vsub.f32 0.0, %v208_v42 }
 0x119   :  { %1013 = vlog2.f32 %v475_v41  ;;  %v1002_v48 = vpop.eup %1001 }
 0x11a   :  { %1015 = vpow2.f32 %v653_v46  ;;  %v220_v55 = vsel %vm105_vm1, %v209_v43, %v219_v47  ;;  %v577_v49 = vmul.f32 0.6931472, %v1002_v48 }
 0x11b   :  { %v221_v52 = vsel %vm128_vm0, %v220_v55, 0.0 }
 0x11c   :  { %v1004_v50 = vpop.eup %1003  ;;  %222 = vadd.xlane.f32.xlu1 %v221_v52  ;;  %v578_v61 = vadd.f32 %v577_v49, %v570_v51 }
 0x11d   :  { %v1006_v53 = vpop.eup %1005  ;;  %v755_v34 = vadd.f32 1.0, %v1004_v50 }
 0x11e   :  { %v1008_v58 = vpop.eup %1007  ;;  %v567_v60 = vmul.f32 0.6931472, %v1006_v53  ;;  %v579_v2 = vsub.f32 0.0, %v578_v61 }
 0x11f   :  { %v745_v62 = vadd.f32 1.0, %v1008_v58  ;;  %1017 = vlog2.f32 %v755_v34 }
 0x120   :  { %v568_v0 = vadd.f32 %v567_v60, %v560_v59  ;;  %402 = vadd.xlane.f32.xlu1 %v401_v63 }
 0x121   :  { %1019 = vlog2.f32 %v745_v62 }
 0x122   :  { %v569_v1 = vsub.f32 0.0, %v568_v0  ;;  %v1010_v3 = vpop.eup %1009 }
 0x123   :  { %v487_v4 = vmul.f32 0.6931472, %v1010_v3 }
 0x124   :  { %v580_v7 = vsel %vm105_vm1, %v569_v1, %v579_v2 }
 0x125   :  { %v1012_v8 = vpop.eup %1011  ;;  %v581_v6 = vsel %vm128_vm0, %v580_v7, 0.0  ;;  %v488_v15 = vadd.f32 %v487_v4, %v480_v5 }
 0x126   :  { %v1014_v9 = vpop.eup %1013  ;;  %v665_v10 = vadd.f32 1.0, %v1012_v8  ;;  %582 = vadd.xlane.f32.xlu1 %v581_v6 }
 0x127   :  { %v1016_v11 = vpop.eup %1015  ;;  %v477_v13 = vmul.f32 0.6931472, %v1014_v9  ;;  %v489_v21 = vsub.f32 0.0, %v488_v15 }
 0x128   :  { %v655_v16 = vadd.f32 1.0, %v1016_v11  ;;  %1021 = vlog2.f32 %v665_v10 }
 0x129   :  { %v478_v18 = vadd.f32 %v477_v13, %v470_v12 }
 0x12a   :  { %1023 = vlog2.f32 %v655_v16 }
 0x12b   :  { %v479_v19 = vsub.f32 0.0, %v478_v18 }
 0x12c   :  { %v1018_v22 = vpop.eup %1017 }
 0x12d   :  { %v490_v27 = vsel %vm105_vm1, %v479_v19, %v489_v21  ;;  %v757_v29 = vmul.f32 0.6931472, %v1018_v22 }
 0x12e   :  { %v1020_v30 = vpop.eup %1019  ;;  %v491_v31 = vsel %vm128_vm0, %v490_v27, 0.0 }
 0x12f   :  { %492 = vadd.xlane.f32.xlu0 %v491_v31  ;;  %v747_v28 = vmul.f32 0.6931472, %v1020_v30  ;;  %v758_v32 = vadd.f32 %v757_v29, %v750_v23 }
 0x131   :  { %v748_v33 = vadd.f32 %v747_v28, %v740_v20  ;;  %v759_v37 = vsub.f32 0.0, %v758_v32 }
 0x133   :  { %v749_v36 = vsub.f32 0.0, %v748_v33 }
 0x135   :  { %v1022_v38 = vpop.eup %1021  ;;  %v760_v39 = vsel %vm105_vm1, %v749_v36, %v759_v37 }
 0x136   :  { %v667_v41 = vmul.f32 0.6931472, %v1022_v38  ;;  %v761_v44 = vsel %vm128_vm0, %v760_v39, 0.0 }
 0x137   :  { %v1024_v26 = vpop.eup %1023  ;;  %762 = vadd.xlane.f32.xlu1 %v761_v44 }
 0x138   :  { %v657_v56 = vmul.f32 0.6931472, %v1024_v26  ;;  %v668_v42 = vadd.f32 %v667_v41, %v660_v40 }
 0x13a   :  { %v658_v45 = vadd.f32 %v657_v56, %v650_v54  ;;  %v669_v43 = vsub.f32 0.0, %v668_v42 }
 0x13c   :  { %v659_v46 = vsub.f32 0.0, %v658_v45 }
 0x13e   :  { %v670_v47 = vsel %vm105_vm1, %v659_v46, %v669_v43 }
 0x13f   :  { %v671_v25 = vsel %vm128_vm0, %v670_v47, 0.0 }
 0x140   :  { %672 = vadd.xlane.f32.xlu0 %v671_v25 }
 0x193   :  { %v131_v48 = vpop.xlane.xlu0 %130 }
 0x194   :  { %v132_v55 = vrot.slane %v131_v48, 4 }
 0x196   :  { %v133_v57 = vadd.f32 %v132_v55, %v131_v48 }
 0x197   :  { %v313_v50 = vpop.xlane.xlu0 %312 }
 0x198   :  { %v134_v49 = vrot.slane %v133_v57, 2  ;;  %v314_v52 = vrot.slane %v313_v50, 4 }
 0x19a   :  { %v135_v51 = vadd.f32 %v134_v49, %v133_v57  ;;  %v315_v53 = vadd.f32 %v314_v52, %v313_v50 }
 0x19c   :  { %v136_v14 = vrot.slane %v135_v51, 1  ;;  %v316_v34 = vrot.slane %v315_v53, 2 }
 0x19e   :  { %v137_v17 = vadd.f32 %v136_v14, %v135_v51  ;;  %v317_v59 = vadd.f32 %v316_v34, %v315_v53 }
 0x1a0   :  { %939 = vpush %v137_v17  ;;  %v318_v63 = vrot.slane %v317_v59, 1 }
 0x1a2   :  { %v319_v8 = vadd.f32 %v318_v63, %v317_v59 }
 0x1a5   :  { %v223_v35 = vpop.xlane.xlu1 %222 }
 0x1a6   :  { %v224_v58 = vrot.slane %v223_v35, 4 }
 0x1a8   :  { %v225_v24 = vadd.f32 %v224_v58, %v223_v35 }
 0x1a9   :  { %v403_v60 = vpop.xlane.xlu1 %402 }
 0x1aa   :  { %v226_v61 = vrot.slane %v225_v24, 2  ;;  %v404_v62 = vrot.slane %v403_v60, 4 }
 0x1ac   :  { %v405_v0 = vadd.f32 %v404_v62, %v403_v60  ;;  %v227_v1 = vadd.f32 %v226_v61, %v225_v24 }
 0x1ae   :  { %v406_v2 = vrot.slane %v405_v0, 2  ;;  %v228_v4 = vrot.slane %v227_v1, 1 }
 0x1af   :  { %v583_v3 = vpop.xlane.xlu1 %582 }
 0x1b0   :  { %v584_v7 = vrot.slane %v583_v3, 4  ;;  %v229_v5 = vadd.f32 %v228_v4, %v227_v1  ;;  %v407_v6 = vadd.f32 %v406_v2, %v405_v0 }
 0x1b2   :  { %v585_v9 = vadd.f32 %v584_v7, %v583_v3  ;;  %941 = vpush %v229_v5  ;;  %v408_v10 = vrot.slane %v407_v6, 1 }
 0x1b3   :  { %943 = vpush %v319_v8 }
 0x1b4   :  { %v409_v11 = vadd.f32 %v408_v10, %v407_v6  ;;  %v586_v12 = vrot.slane %v585_v9, 2 }
 0x1b6   :  { %945 = vpush %v409_v11  ;;  %v587_v16 = vadd.f32 %v586_v12, %v585_v9 }
 0x1b8   :  { %v493_v13 = vpop.xlane.xlu0 %492  ;;  %v588_v21 = vrot.slane %v587_v16, 1 }
 0x1b9   :  { %v494_v15 = vrot.slane %v493_v13, 4 }
 0x1ba   :  { %v589_v30 = vadd.f32 %v588_v21, %v587_v16 }
 0x1bb   :  { %v495_v18 = vadd.f32 %v494_v15, %v493_v13 }
 0x1bd   :  { %v496_v19 = vrot.slane %v495_v18, 2 }
 0x1bf   :  { %v497_v22 = vadd.f32 %v496_v19, %v495_v18 }
 0x1c0   :  { %v763_v23 = vpop.xlane.xlu1 %762 }
 0x1c1   :  { %v764_v27 = vrot.slane %v763_v23, 4  ;;  %v498_v29 = vrot.slane %v497_v22, 1 }
 0x1c3   :  { %v765_v31 = vadd.f32 %v764_v27, %v763_v23  ;;  %v499_v20 = vadd.f32 %v498_v29, %v497_v22 }
 0x1c5   :  { %947 = vpush %v499_v20  ;;  %v766_v28 = vrot.slane %v765_v31, 2 }
 0x1c6   :  { %949 = vpush %v589_v30 }
 0x1c7   :  { %v767_v36 = vadd.f32 %v766_v28, %v765_v31 }
 0x1c9   :  { %v673_v32 = vpop.xlane.xlu0 %672  ;;  %v768_v39 = vrot.slane %v767_v36, 1 }
 0x1ca   :  { %v674_v33 = vrot.slane %v673_v32, 4 }
 0x1cb   :  { %v769_v44 = vadd.f32 %v768_v39, %v767_v36 }
 0x1cc   :  { %v675_v37 = vadd.f32 %v674_v33, %v673_v32 }
 0x1ce   :  { %v676_v38 = vrot.slane %v675_v37, 2 }
 0x1d0   :  { %v677_v40 = vadd.f32 %v676_v38, %v675_v37 }
 0x1d1   :  { %s940_s29 = spop %939 }
 0x1d2   :  { %v678_v41 = vrot.slane %v677_v40, 1  ;;  %v139_v26 = vstv %s940_s29 }
 0x1d3   :  { %v141_v56 = vmul.f32 0.125, %v139_v26 }
 0x1d4   :  { %v679_v54 = vadd.f32 %v678_v41, %v677_v40 }
 0x1d5   :  { %v142_v42 = vsub.f32 0.0, %v141_v56 }
 0x1d6   :  { %951 = vpush %v679_v54 }
 0x1d7   :  { %953 = vpush %v769_v44 }
 0x1d8   :  { %144 = vst.msk [vmem:[%s1349_s4] sm:$0x1] %vm143_vm2, %v142_v42 }
 0x1e3   :  { %s942_s2 = spop %941 }
 0x1e4   :  { %v231_v45 = vstv %s942_s2  ;;  %s944_s8 = spop %943 }
 0x1e5   :  { %v232_v46 = vmul.f32 0.125, %v231_v45  ;;  %v321_v43 = vstv %s944_s8 }
 0x1e6   :  { %v322_v47 = vmul.f32 0.125, %v321_v43 }
 0x1e7   :  { %v233_v25 = vsub.f32 0.0, %v232_v46  ;;  %s946_s9 = spop %945 }
 0x1e8   :  { %v323_v48 = vsub.f32 0.0, %v322_v47  ;;  %v411_v55 = vstv %s946_s9 }
 0x1e9   :  { %234 = vst.msk [vmem:[%s1349_s4 + $0x1] sm:$0x1] %vm143_vm2, %v233_v25  ;;  %v412_v57 = vmul.f32 0.125, %v411_v55 }
 0x1ea   :  { %324 = vst.msk [vmem:[%s1349_s4 + $0x2] sm:$0x1] %vm143_vm2, %v323_v48 }
 0x1eb   :  { %v413_v49 = vsub.f32 0.0, %v412_v57 }
 0x1ed   :  { %414 = vst.msk [vmem:[%s1349_s4 + $0x3] sm:$0x1] %vm143_vm2, %v413_v49 }
 0x1f6   :  { %s948_s15 = spop %947 }
 0x1f7   :  { %v501_v50 = vstv %s948_s15  ;;  %s950_s27 = spop %949 }
 0x1f8   :  { %v502_v51 = vmul.f32 0.125, %v501_v50  ;;  %v591_v52 = vstv %s950_s27 }
 0x1f9   :  { %v592_v14 = vmul.f32 0.125, %v591_v52 }
 0x1fa   :  { %v503_v17 = vsub.f32 0.0, %v502_v51 }
 0x1fb   :  { %v593_v53 = vsub.f32 0.0, %v592_v14 }
 0x1fc   :  { %504 = vst.msk [vmem:[%s1349_s4 + $0x4] sm:$0x1] %vm143_vm2, %v503_v17 }
 0x1fd   :  { %594 = vst.msk [vmem:[%s1349_s4 + $0x5] sm:$0x1] %vm143_vm2, %v593_v53 }
 0x207   :  { %s952_s5 = spop %951 }
 0x208   :  { %v681_v34 = vstv %s952_s5  ;;  %s954_s20 = spop %953 }
 0x209   :  { %v682_v35 = vmul.f32 0.125, %v681_v34  ;;  %v771_v58 = vstv %s954_s20 }
 0x20a   :  { %v772_v59 = vmul.f32 0.125, %v771_v58 }
 0x20b   :  { %v683_v24 = vsub.f32 0.0, %v682_v35 }
 0x20c   :  { %v773_v60 = vsub.f32 0.0, %v772_v59 }
 0x20d   :  { %684 = vst.msk [vmem:[%s1349_s4 + $0x6] sm:$0x1] %vm143_vm2, %v683_v24 }
 0x20e   :  { %774 = vst.msk [vmem:[%s1349_s4 + $0x7] sm:$0x1] %vm143_vm2, %v773_v60 }
 0x20f   :  { %779 = vsyncpa [#allocation7], 1 }
 0x210   :  { %780 = vsyncpa [#allocation9], 1 }

</bundles_post_ra>
